<compile_context>
chip_gen: v6e
topology: v6e:2x2x1
jax: 0.10.0
libtpu: 0.0.40
codegen_flags: <defaults>
</compile_context>

<pallas_src>
import functools

import jax
import jax.numpy as jnp
from jax.experimental import pallas as pl
from jax.experimental.pallas import tpu as pltpu

NUM_GROUPS = 16
GN_EPS = 1e-5
BN_EPS = 1e-5


def _round_up(x, m):
    return ((x + m - 1) // m) * m


def _render_trans_kernel(gp_ref, xh_ref, ph_ref, w1_ref, gng_ref, gnb_ref,
                         gm_ref, ge_ref, w3_ref, bnhs_ref, bnhb_ref,
                         wst_ref, bnus_ref, bnub_ref, out_ref,
                         *, Wr, ML, NLp, Ch, Cl):
    # Static shapes (per grid step b):
    #   gp_ref : (1, 1, Cl)        f32  global-avg-pooled x_low
    #   xh_ref : (1, NHp, Ch)      bf16 flattened zero-padded x_high (+1 front pad)
    #   ph_ref : (1, 4*NLp, Cl)    bf16 4 flattened, left-col-padded stride-2 phases
    #   w3_ref : (9*Ch, Cp)        bf16 3x3 conv taps stacked ky-major, kx-minor
    #   wst_ref: (9*Cl, Cp)        bf16 stride-2 3x3 conv taps, same ordering
    #   out_ref: (1, ML, Cp)       f32  ML = H*(W+2) rows, valid cols px in 1..W

    # ---- conv1x1 -> GroupNorm(16) -> ReLU per-channel gate (all f32) -------
    gp = gp_ref[0]                                                       # (1, Cl)
    g1 = jnp.dot(gp, w1_ref[...], preferred_element_type=jnp.float32)    # (1, Cp)
    mu = jnp.dot(jnp.dot(g1, gm_ref[...], preferred_element_type=jnp.float32),
                 ge_ref[...], preferred_element_type=jnp.float32)        # (1, Cp)
    cen = g1 - mu
    var = jnp.dot(jnp.dot(cen * cen, gm_ref[...], preferred_element_type=jnp.float32),
                  ge_ref[...], preferred_element_type=jnp.float32)       # (1, Cp)
    gn = cen * jax.lax.rsqrt(var + GN_EPS)
    gate = jnp.maximum(gn * gng_ref[...] + gnb_ref[...], 0.0)            # (1, Cp)

    # ---- 3x3 pad-1 conv on x_high: 9 shifted flat row-slices -> MXU --------
    # Each tap is a pure 2-D slice (no reshape / relayout); bf16 operands,
    # f32 accumulation in vregs.
    # TODO(synk): fuse the 9 taps into one K=9*Ch matmul via minor-dim concat
    # once that lowering is validated; also add H-row spatial tiling for
    # production feature-map sizes (v7x 64 MiB VMEM).
    acc_h = None
    for ky in range(3):
        for kx in range(3):
            t = ky * 3 + kx
            patch = xh_ref[0, pl.ds(ky * Wr + kx, ML), :]                # (ML, Ch) bf16
            wt = w3_ref[pl.ds(t * Ch, Ch), :]                            # (Ch, Cp) bf16
            c = jnp.dot(patch, wt, preferred_element_type=jnp.float32)
            acc_h = c if acc_h is None else acc_h + c
    x_att = (acc_h * bnhs_ref[...] + bnhb_ref[...]) * gate               # (ML, Cp)

    # ---- 3x3 stride-2 pad-1 conv on x_low via the 4 even/odd phases --------
    acc_l = None
    for ky in range(3):
        p, oy = ky % 2, ky // 2
        for kx in range(3):
            q, ox = kx % 2, kx // 2
            t = ky * 3 + kx
            start = (p * 2 + q) * NLp + oy * Wr + ox
            patch = ph_ref[0, pl.ds(start, ML), :]                       # (ML, Cl) bf16
            wt = wst_ref[pl.ds(t * Cl, Cl), :]                           # (Cl, Cp) bf16
            c = jnp.dot(patch, wt, preferred_element_type=jnp.float32)
            acc_l = c if acc_l is None else acc_l + c
    x_low_v = acc_l * bnus_ref[...] + bnub_ref[...]                      # (ML, Cp)

    # ---- add + ReLU; single unmasked, lane-dense (ML, 128) store -----------
    out_ref[0, :, :] = jnp.maximum(x_low_v + x_att, 0.0)


def init_params(key, channels_high, channels_low):
    Ch, Cl = channels_high, channels_low
    ks = jax.random.split(key, 13)
    p = {}
    p["w1x1"] = jax.random.normal(ks[0], (Cl, Ch), jnp.float32) / jnp.sqrt(Cl)
    p["gn_gamma"] = 1.0 + 0.1 * jax.random.normal(ks[1], (Ch,), jnp.float32)
    p["gn_beta"] = 0.1 * jax.random.normal(ks[2], (Ch,), jnp.float32)
    p["w3x3"] = jax.random.normal(ks[3], (3, 3, Ch, Ch), jnp.float32) / jnp.sqrt(9 * Ch)
    p["bnh_gamma"] = 1.0 + 0.1 * jax.random.normal(ks[4], (Ch,), jnp.float32)
    p["bnh_beta"] = 0.1 * jax.random.normal(ks[5], (Ch,), jnp.float32)
    p["bnh_mean"] = 0.1 * jax.random.normal(ks[6], (Ch,), jnp.float32)
    p["bnh_var"] = jax.random.uniform(ks[7], (Ch,), jnp.float32, 0.5, 1.5)
    p["wstr"] = jax.random.normal(ks[8], (3, 3, Cl, Ch), jnp.float32) / jnp.sqrt(9 * Cl)
    p["bnu_gamma"] = 1.0 + 0.1 * jax.random.normal(ks[9], (Ch,), jnp.float32)
    p["bnu_beta"] = 0.1 * jax.random.normal(ks[10], (Ch,), jnp.float32)
    p["bnu_mean"] = 0.1 * jax.random.normal(ks[11], (Ch,), jnp.float32)
    p["bnu_var"] = jax.random.uniform(ks[12], (Ch,), jnp.float32, 0.5, 1.5)
    return p


def render_trans_forward(x_high_nchw, x_low_nchw, params):
    # TODO(synk): level > 1 (chained stride-2 convs) not implemented; the PyTorch
    # module only typechecks for level > 1 when channels_low == channels_high.
    Ch = params["w3x3"].shape[-1]
    Cl = params["wstr"].shape[-2]
    G = NUM_GROUPS
    cpg = Ch // G
    Cp = _round_up(Ch, 128)                      # lane-dense padded channel count

    xh = jnp.transpose(x_high_nchw, (0, 2, 3, 1)).astype(jnp.float32)    # NHWC
    xl = jnp.transpose(x_low_nchw, (0, 2, 3, 1)).astype(jnp.float32)     # NHWC
    B, H, W, _ = xh.shape
    _, h, w, _ = xl.shape
    assert h == 2 * H and w == 2 * W, "level=1 expects x_low spatial = 2x x_high"

    Wr = W + 2                     # padded row width == accumulator row width
    ML = H * Wr                    # accumulator rows; valid output at cols 1..W
    Hp = H + 1                     # stride-2 phase row count after spatial pad

    # ---- global average pool of x_low in f32 on the host (tiny (B,Cl)) -----
    gp = jnp.mean(xl, axis=(1, 2)).reshape(B, 1, Cl)

    # ---- x_high: zero-pad, flatten rows, front/back flat pad, cast bf16 ----
    # Tap (ky,kx) then reads rows [ky*Wr + kx, +ML) of the flat array.
    NHp = _round_up((H + 2) * Wr + 2, 16)
    xh_pad = jnp.pad(xh, ((0, 0), (1, 1), (1, 1), (0, 0)))               # (B,H+2,W+2,Ch)
    xh_flat = xh_pad.reshape(B, (H + 2) * Wr, Ch)
    xh_flat = jnp.pad(xh_flat, ((0, 0), (1, NHp - (H + 2) * Wr - 1), (0, 0)))
    xh_flat = xh_flat.astype(jnp.bfloat16)                               # (B, NHp, Ch)

    # ---- x_low: zero-pad, even/odd phase split, left column pad, flatten ---
    # Phase (p,q) tap (oy,ox) reads rows [(2p+q)*NLp + oy*Wr + ox, +ML).
    NLp = _round_up(Hp * Wr + 1, 16)
    xl_pad = jnp.pad(xl, ((0, 0), (1, 1), (1, 1), (0, 0)))               # (B,h+2,w+2,Cl)
    phases = []
    for p in (0, 1):
        for q in (0, 1):
            ph = xl_pad[:, p::2, q::2, :]                                # (B, Hp, W+1, Cl)
            ph = jnp.pad(ph, ((0, 0), (0, 0), (1, 0), (0, 0)))           # (B, Hp, Wr, Cl)
            ph = ph.reshape(B, Hp * Wr, Cl)
            ph = jnp.pad(ph, ((0, 0), (0, NLp - Hp * Wr), (0, 0)))
            phases.append(ph)
    ph_flat = jnp.concatenate(phases, axis=1).astype(jnp.bfloat16)       # (B, 4*NLp, Cl)

    # ---- weights: fold eval-BN, pad output channels to Cp, flatten, bf16 ---
    def pad_n(a):
        return jnp.pad(a, [(0, 0)] * (a.ndim - 1) + [(0, Cp - Ch)])

    w3f = pad_n(params["w3x3"].reshape(9, Ch, Ch)).reshape(9 * Ch, Cp).astype(jnp.bfloat16)
    wstf = pad_n(params["wstr"].reshape(9, Cl, Ch)).reshape(9 * Cl, Cp).astype(jnp.bfloat16)
    w1p = pad_n(params["w1x1"]).astype(jnp.float32)                      # (Cl, Cp)
    gng = pad_n(params["gn_gamma"].reshape(1, Ch)).astype(jnp.float32)
    gnb = pad_n(params["gn_beta"].reshape(1, Ch)).astype(jnp.float32)

    def bn_fold(gamma, beta, mean, var):
        s = gamma / jnp.sqrt(var + BN_EPS)
        return (pad_n(s.reshape(1, Ch)).astype(jnp.float32),
                pad_n((beta - mean * s).reshape(1, Ch)).astype(jnp.float32))

    bnh_s, bnh_b = bn_fold(params["bnh_gamma"], params["bnh_beta"],
                           params["bnh_mean"], params["bnh_var"])
    bnu_s, bnu_b = bn_fold(params["bnu_gamma"], params["bnu_beta"],
                           params["bnu_mean"], params["bnu_var"])

    # GroupNorm group-average / group-expand matrices (padded lanes excluded)
    gid = jnp.arange(Ch) // cpg
    ge_small = (gid[None, :] == jnp.arange(G)[:, None]).astype(jnp.float32)   # (G, Ch)
    ge_mat = jnp.pad(ge_small, ((0, 0), (0, Cp - Ch)))                        # (G, Cp)
    gm_mat = jnp.pad(ge_small.T / float(cpg), ((0, Cp - Ch), (0, 0)))         # (Cp, G)

    # Scoped-VMEM budget: actual kernel-visible block bytes, x2 double
    # buffering, generous headroom; well under every generation's physical VMEM.
    block_bytes = (Cl * 4 + NHp * Ch * 2 + 4 * NLp * Cl * 2 + Cl * Cp * 4
                   + 6 * Cp * 4 + Cp * G * 4 + G * Cp * 4
                   + 9 * Ch * Cp * 2 + 9 * Cl * Cp * 2 + ML * Cp * 4)
    vmem_limit = int(min(100 * 1024 * 1024, max(16 * 1024 * 1024, 4 * block_bytes)))

    kernel = functools.partial(_render_trans_kernel,
                               Wr=Wr, ML=ML, NLp=NLp, Ch=Ch, Cl=Cl)

    out_flat = pl.pallas_call(
        kernel,
        out_shape=jax.ShapeDtypeStruct((B, ML, Cp), jnp.float32),
        grid=(B,),
        in_specs=[
            pl.BlockSpec((1, 1, Cl), lambda b: (b, 0, 0)),         # gp
            pl.BlockSpec((1, NHp, Ch), lambda b: (b, 0, 0)),       # x_high flat (bf16)
            pl.BlockSpec((1, 4 * NLp, Cl), lambda b: (b, 0, 0)),   # x_low phases (bf16)
            pl.BlockSpec((Cl, Cp), lambda b: (0, 0)),              # w1x1
            pl.BlockSpec((1, Cp), lambda b: (0, 0)),               # GN gamma
            pl.BlockSpec((1, Cp), lambda b: (0, 0)),               # GN beta
            pl.BlockSpec((Cp, G), lambda b: (0, 0)),               # group-average
            pl.BlockSpec((G, Cp), lambda b: (0, 0)),               # group-expand
            pl.BlockSpec((9 * Ch, Cp), lambda b: (0, 0)),          # conv3x3 taps
            pl.BlockSpec((1, Cp), lambda b: (0, 0)),               # BN_high scale
            pl.BlockSpec((1, Cp), lambda b: (0, 0)),               # BN_high shift
            pl.BlockSpec((9 * Cl, Cp), lambda b: (0, 0)),          # stride-2 conv taps
            pl.BlockSpec((1, Cp), lambda b: (0, 0)),               # BN_up scale
            pl.BlockSpec((1, Cp), lambda b: (0, 0)),               # BN_up shift
        ],
        out_specs=pl.BlockSpec((1, ML, Cp), lambda b: (b, 0, 0)),
        compiler_params=pltpu.CompilerParams(
            dimension_semantics=("parallel",),
            vmem_limit_bytes=vmem_limit),
    )(gp, xh_flat, ph_flat, w1p, gng, gnb, gm_mat, ge_mat,
      w3f, bnh_s, bnh_b, wstf, bnu_s, bnu_b)

    # Strip padded channels and the 2 garbage border columns, return NCHW.
    out = out_flat[:, :, :Ch].reshape(B, H, Wr, Ch)[:, :, 1:W + 1, :]
    return jnp.transpose(out, (0, 3, 1, 2))


def reference_forward(x_high_nchw, x_low_nchw, params):
    """Pure-JAX f32 reference (same eval-mode BN semantics)."""
    hp = jax.lax.Precision.HIGHEST
    Ch = params["w3x3"].shape[-1]
    xh = jnp.transpose(x_high_nchw, (0, 2, 3, 1)).astype(jnp.float32)
    xl = jnp.transpose(x_low_nchw, (0, 2, 3, 1)).astype(jnp.float32)
    B = xl.shape[0]

    gp = jnp.mean(xl, axis=(1, 2))                                     # (B, Cl)
    g1 = jnp.dot(gp, params["w1x1"], precision=hp)                     # (B, Ch)
    cpg = Ch // NUM_GROUPS
    g1g = g1.reshape(B, NUM_GROUPS, cpg)
    mu = g1g.mean(axis=2, keepdims=True)
    var = ((g1g - mu) ** 2).mean(axis=2, keepdims=True)
    gn = ((g1g - mu) / jnp.sqrt(var + GN_EPS)).reshape(B, Ch)
    gate = jnp.maximum(gn * params["gn_gamma"] + params["gn_beta"], 0.0)

    xh_mask = jax.lax.conv_general_dilated(
        xh, params["w3x3"], (1, 1), ((1, 1), (1, 1)),
        dimension_numbers=("NHWC", "HWIO", "NHWC"), precision=hp)
    s1 = params["bnh_gamma"] / jnp.sqrt(params["bnh_var"] + BN_EPS)
    xh_mask = xh_mask * s1 + (params["bnh_beta"] - params["bnh_mean"] * s1)
    x_att = xh_mask * gate[:, None, None, :]

    xlv = jax.lax.conv_general_dilated(
        xl, params["wstr"], (2, 2), ((1, 1), (1, 1)),
        dimension_numbers=("NHWC", "HWIO", "NHWC"), precision=hp)
    s2 = params["bnu_gamma"] / jnp.sqrt(params["bnu_var"] + BN_EPS)
    xlv = xlv * s2 + (params["bnu_beta"] - params["bnu_mean"] * s2)

    out = jnp.maximum(xlv + x_att, 0.0)
    return jnp.transpose(out, (0, 3, 1, 2))


if __name__ == "__main__":
    key = jax.random.PRNGKey(0)
    k1, k2, k3 = jax.random.split(key, 3)

    channels_high, channels_low = 32, 16     # GroupNorm(16, Ch) => Ch % 16 == 0
    B = 2
    H, W = 8, 8                              # x_high spatial
    h, w = 16, 16                            # x_low spatial (level=1 -> 2x)

    x_high = jax.random.normal(k1, (B, channels_high, H, W), jnp.float32)
    x_low = jax.random.normal(k2, (B, channels_low, h, w), jnp.float32)
    params = init_params(k3, channels_high, channels_low)

    fwd = jax.jit(render_trans_forward)
    out = jax.block_until_ready(fwd(x_high, x_low, params))

    ref = jax.block_until_ready(reference_forward(x_high, x_low, params))
    assert out.shape == (B, channels_high, H, W)
    max_diff = float(jnp.max(jnp.abs(out - ref)))
    # Kernel uses bf16 MXU operands (K up to 9*Ch=288) vs. an f32 HIGHEST
    # reference, so allow a slightly looser tolerance than pure-f32.
    assert jnp.allclose(out, ref, rtol=2e-2, atol=3e-2), max_diff

    print("KERNEL_OK")
</pallas_src>

<mosaic_0001>
module attributes {stable_mosaic.version = 11 : i64} {
  func.func @_render_trans_kernel(%arg0: i32, %arg1: memref<1x1x16xf32, #tpu.memory_space<vmem>>, %arg2: memref<1x112x32xbf16, #tpu.memory_space<vmem>>, %arg3: memref<1x384x16xbf16, #tpu.memory_space<vmem>>, %arg4: memref<16x128xf32, #tpu.memory_space<vmem>>, %arg5: memref<1x128xf32, #tpu.memory_space<vmem>>, %arg6: memref<1x128xf32, #tpu.memory_space<vmem>>, %arg7: memref<128x16xf32, #tpu.memory_space<vmem>>, %arg8: memref<16x128xf32, #tpu.memory_space<vmem>>, %arg9: memref<288x128xbf16, #tpu.memory_space<vmem>>, %arg10: memref<1x128xf32, #tpu.memory_space<vmem>>, %arg11: memref<1x128xf32, #tpu.memory_space<vmem>>, %arg12: memref<144x128xbf16, #tpu.memory_space<vmem>>, %arg13: memref<1x128xf32, #tpu.memory_space<vmem>>, %arg14: memref<1x128xf32, #tpu.memory_space<vmem>>, %arg15: memref<1x80x128xf32, #tpu.memory_space<vmem>>) attributes {dimension_semantics = [#tpu.dimension_semantics<parallel>], iteration_bounds = array<i64: 2>, scalar_prefetch = 0 : i64, scratch_operands = 0 : i64, tpu.core_type = #tpu.core_type<tc>, window_params = [{transform_indices = @transform_0, window_bounds = array<i64: 1, 1, 16>}, {transform_indices = @transform_1, window_bounds = array<i64: 1, 112, 32>}, {transform_indices = @transform_2, window_bounds = array<i64: 1, 384, 16>}, {pipeline_mode = #tpu.pipeline_mode<synchronous>, transform_indices = @transform_3, window_bounds = array<i64: 16, 128>}, {pipeline_mode = #tpu.pipeline_mode<synchronous>, transform_indices = @transform_4, window_bounds = array<i64: 1, 128>}, {pipeline_mode = #tpu.pipeline_mode<synchronous>, transform_indices = @transform_5, window_bounds = array<i64: 1, 128>}, {pipeline_mode = #tpu.pipeline_mode<synchronous>, transform_indices = @transform_6, window_bounds = array<i64: 128, 16>}, {pipeline_mode = #tpu.pipeline_mode<synchronous>, transform_indices = @transform_7, window_bounds = array<i64: 16, 128>}, {pipeline_mode = #tpu.pipeline_mode<synchronous>, transform_indices = @transform_8, window_bounds = array<i64: 288, 128>}, {pipeline_mode = #tpu.pipeline_mode<synchronous>, transform_indices = @transform_9, window_bounds = array<i64: 1, 128>}, {pipeline_mode = #tpu.pipeline_mode<synchronous>, transform_indices = @transform_10, window_bounds = array<i64: 1, 128>}, {pipeline_mode = #tpu.pipeline_mode<synchronous>, transform_indices = @transform_11, window_bounds = array<i64: 144, 128>}, {pipeline_mode = #tpu.pipeline_mode<synchronous>, transform_indices = @transform_12, window_bounds = array<i64: 1, 128>}, {pipeline_mode = #tpu.pipeline_mode<synchronous>, transform_indices = @transform_13, window_bounds = array<i64: 1, 128>}, {transform_indices = @transform_14, window_bounds = array<i64: 1, 80, 128>}]} {
    %c0 = arith.constant 0 : index
    %c0_0 = arith.constant 0 : index
    %c0_1 = arith.constant 0 : index
    %0 = vector.load %arg1[%c0, %c0_0, %c0_1] : memref<1x1x16xf32, #tpu.memory_space<vmem>>, vector<1x1x16xf32>
    %1 = vector.shape_cast %0 : vector<1x1x16xf32> to vector<1x16xf32>
    %c0_2 = arith.constant 0 : index
    %c0_3 = arith.constant 0 : index
    %2 = vector.load %arg4[%c0_2, %c0_3] : memref<16x128xf32, #tpu.memory_space<vmem>>, vector<16x128xf32>
    %cst = arith.constant dense<0.000000e+00> : vector<1x128xf32>
    %3 = tpu.matmul %1, %2, %cst {dimension_numbers = #tpu.dot_dimension_numbers<[1], [0], [0], [1], [0, 0, 1, 1], [], []>} : vector<1x16xf32>, vector<16x128xf32>, vector<1x128xf32> -> vector<1x128xf32>
    %c0_4 = arith.constant 0 : index
    %c0_5 = arith.constant 0 : index
    %4 = vector.load %arg7[%c0_4, %c0_5] : memref<128x16xf32, #tpu.memory_space<vmem>>, vector<128x16xf32>
    %cst_6 = arith.constant dense<0.000000e+00> : vector<1x16xf32>
    %5 = tpu.matmul %3, %4, %cst_6 {dimension_numbers = #tpu.dot_dimension_numbers<[1], [0], [0], [1], [0, 0, 1, 1], [], []>} : vector<1x128xf32>, vector<128x16xf32>, vector<1x16xf32> -> vector<1x16xf32>
    %c0_7 = arith.constant 0 : index
    %c0_8 = arith.constant 0 : index
    %6 = vector.load %arg8[%c0_7, %c0_8] : memref<16x128xf32, #tpu.memory_space<vmem>>, vector<16x128xf32>
    %cst_9 = arith.constant dense<0.000000e+00> : vector<1x128xf32>
    %7 = tpu.matmul %5, %6, %cst_9 {dimension_numbers = #tpu.dot_dimension_numbers<[1], [0], [0], [1], [0, 0, 1, 1], [], []>} : vector<1x16xf32>, vector<16x128xf32>, vector<1x128xf32> -> vector<1x128xf32>
    %8 = arith.subf %3, %7 : vector<1x128xf32>
    %9 = arith.mulf %8, %8 : vector<1x128xf32>
    %c0_10 = arith.constant 0 : index
    %c0_11 = arith.constant 0 : index
    %10 = vector.load %arg7[%c0_10, %c0_11] : memref<128x16xf32, #tpu.memory_space<vmem>>, vector<128x16xf32>
    %cst_12 = arith.constant dense<0.000000e+00> : vector<1x16xf32>
    %11 = tpu.matmul %9, %10, %cst_12 {dimension_numbers = #tpu.dot_dimension_numbers<[1], [0], [0], [1], [0, 0, 1, 1], [], []>} : vector<1x128xf32>, vector<128x16xf32>, vector<1x16xf32> -> vector<1x16xf32>
    %c0_13 = arith.constant 0 : index
    %c0_14 = arith.constant 0 : index
    %12 = vector.load %arg8[%c0_13, %c0_14] : memref<16x128xf32, #tpu.memory_space<vmem>>, vector<16x128xf32>
    %cst_15 = arith.constant dense<0.000000e+00> : vector<1x128xf32>
    %13 = tpu.matmul %11, %12, %cst_15 {dimension_numbers = #tpu.dot_dimension_numbers<[1], [0], [0], [1], [0, 0, 1, 1], [], []>} : vector<1x16xf32>, vector<16x128xf32>, vector<1x128xf32> -> vector<1x128xf32>
    %cst_16 = arith.constant 9.99999974E-6 : f32
    %14 = vector.broadcast %cst_16 : f32 to vector<1x128xf32>
    %15 = arith.addf %13, %14 : vector<1x128xf32>
    %16 = math.rsqrt %15 : vector<1x128xf32>
    %17 = arith.mulf %8, %16 : vector<1x128xf32>
    %c0_17 = arith.constant 0 : index
    %c0_18 = arith.constant 0 : index
    %18 = vector.load %arg5[%c0_17, %c0_18] : memref<1x128xf32, #tpu.memory_space<vmem>>, vector<1x128xf32>
    %19 = arith.mulf %17, %18 : vector<1x128xf32>
    %c0_19 = arith.constant 0 : index
    %c0_20 = arith.constant 0 : index
    %20 = vector.load %arg6[%c0_19, %c0_20] : memref<1x128xf32, #tpu.memory_space<vmem>>, vector<1x128xf32>
    %21 = arith.addf %19, %20 : vector<1x128xf32>
    %cst_21 = arith.constant 0.000000e+00 : f32
    %22 = vector.broadcast %cst_21 : f32 to vector<1x128xf32>
    %23 = arith.maximumf %21, %22 : vector<1x128xf32>
    %c0_22 = arith.constant 0 : index
    %c0_23 = arith.constant 0 : index
    %c0_24 = arith.constant 0 : index
    %24 = vector.load %arg2[%c0_22, %c0_23, %c0_24] : memref<1x112x32xbf16, #tpu.memory_space<vmem>>, vector<1x80x32xbf16>
    %25 = vector.shape_cast %24 : vector<1x80x32xbf16> to vector<80x32xbf16>
    %c0_25 = arith.constant 0 : index
    %c0_26 = arith.constant 0 : index
    %26 = vector.load %arg9[%c0_25, %c0_26] : memref<288x128xbf16, #tpu.memory_space<vmem>>, vector<32x128xbf16>
    %cst_27 = arith.constant dense<0.000000e+00> : vector<80x128xf32>
    %27 = tpu.matmul %25, %26, %cst_27 {dimension_numbers = #tpu.dot_dimension_numbers<[1], [0], [0], [1], [0, 0, 1, 1], [], []>} : vector<80x32xbf16>, vector<32x128xbf16>, vector<80x128xf32> -> vector<80x128xf32>
    %c0_28 = arith.constant 0 : index
    %c1 = arith.constant 1 : index
    %c0_29 = arith.constant 0 : index
    %28 = vector.load %arg2[%c0_28, %c1, %c0_29] : memref<1x112x32xbf16, #tpu.memory_space<vmem>>, vector<1x80x32xbf16>
    %29 = vector.shape_cast %28 : vector<1x80x32xbf16> to vector<80x32xbf16>
    %c32 = arith.constant 32 : index
    %c0_30 = arith.constant 0 : index
    %30 = vector.load %arg9[%c32, %c0_30] : memref<288x128xbf16, #tpu.memory_space<vmem>>, vector<32x128xbf16>
    %cst_31 = arith.constant dense<0.000000e+00> : vector<80x128xf32>
    %31 = tpu.matmul %29, %30, %cst_31 {dimension_numbers = #tpu.dot_dimension_numbers<[1], [0], [0], [1], [0, 0, 1, 1], [], []>} : vector<80x32xbf16>, vector<32x128xbf16>, vector<80x128xf32> -> vector<80x128xf32>
    %32 = arith.addf %27, %31 : vector<80x128xf32>
    %c0_32 = arith.constant 0 : index
    %c2 = arith.constant 2 : index
    %c0_33 = arith.constant 0 : index
    %33 = vector.load %arg2[%c0_32, %c2, %c0_33] : memref<1x112x32xbf16, #tpu.memory_space<vmem>>, vector<1x80x32xbf16>
    %34 = vector.shape_cast %33 : vector<1x80x32xbf16> to vector<80x32xbf16>
    %c64 = arith.constant 64 : index
    %c0_34 = arith.constant 0 : index
    %35 = vector.load %arg9[%c64, %c0_34] : memref<288x128xbf16, #tpu.memory_space<vmem>>, vector<32x128xbf16>
    %cst_35 = arith.constant dense<0.000000e+00> : vector<80x128xf32>
    %36 = tpu.matmul %34, %35, %cst_35 {dimension_numbers = #tpu.dot_dimension_numbers<[1], [0], [0], [1], [0, 0, 1, 1], [], []>} : vector<80x32xbf16>, vector<32x128xbf16>, vector<80x128xf32> -> vector<80x128xf32>
    %37 = arith.addf %32, %36 : vector<80x128xf32>
    %c0_36 = arith.constant 0 : index
    %c10 = arith.constant 10 : index
    %c0_37 = arith.constant 0 : index
    %38 = vector.load %arg2[%c0_36, %c10, %c0_37] : memref<1x112x32xbf16, #tpu.memory_space<vmem>>, vector<1x80x32xbf16>
    %39 = vector.shape_cast %38 : vector<1x80x32xbf16> to vector<80x32xbf16>
    %c96 = arith.constant 96 : index
    %c0_38 = arith.constant 0 : index
    %40 = vector.load %arg9[%c96, %c0_38] : memref<288x128xbf16, #tpu.memory_space<vmem>>, vector<32x128xbf16>
    %cst_39 = arith.constant dense<0.000000e+00> : vector<80x128xf32>
    %41 = tpu.matmul %39, %40, %cst_39 {dimension_numbers = #tpu.dot_dimension_numbers<[1], [0], [0], [1], [0, 0, 1, 1], [], []>} : vector<80x32xbf16>, vector<32x128xbf16>, vector<80x128xf32> -> vector<80x128xf32>
    %42 = arith.addf %37, %41 : vector<80x128xf32>
    %c0_40 = arith.constant 0 : index
    %c11 = arith.constant 11 : index
    %c0_41 = arith.constant 0 : index
    %43 = vector.load %arg2[%c0_40, %c11, %c0_41] : memref<1x112x32xbf16, #tpu.memory_space<vmem>>, vector<1x80x32xbf16>
    %44 = vector.shape_cast %43 : vector<1x80x32xbf16> to vector<80x32xbf16>
    %c128 = arith.constant 128 : index
    %c0_42 = arith.constant 0 : index
    %45 = vector.load %arg9[%c128, %c0_42] : memref<288x128xbf16, #tpu.memory_space<vmem>>, vector<32x128xbf16>
    %cst_43 = arith.constant dense<0.000000e+00> : vector<80x128xf32>
    %46 = tpu.matmul %44, %45, %cst_43 {dimension_numbers = #tpu.dot_dimension_numbers<[1], [0], [0], [1], [0, 0, 1, 1], [], []>} : vector<80x32xbf16>, vector<32x128xbf16>, vector<80x128xf32> -> vector<80x128xf32>
    %47 = arith.addf %42, %46 : vector<80x128xf32>
    %c0_44 = arith.constant 0 : index
    %c12 = arith.constant 12 : index
    %c0_45 = arith.constant 0 : index
    %48 = vector.load %arg2[%c0_44, %c12, %c0_45] : memref<1x112x32xbf16, #tpu.memory_space<vmem>>, vector<1x80x32xbf16>
    %49 = vector.shape_cast %48 : vector<1x80x32xbf16> to vector<80x32xbf16>
    %c160 = arith.constant 160 : index
    %c0_46 = arith.constant 0 : index
    %50 = vector.load %arg9[%c160, %c0_46] : memref<288x128xbf16, #tpu.memory_space<vmem>>, vector<32x128xbf16>
    %cst_47 = arith.constant dense<0.000000e+00> : vector<80x128xf32>
    %51 = tpu.matmul %49, %50, %cst_47 {dimension_numbers = #tpu.dot_dimension_numbers<[1], [0], [0], [1], [0, 0, 1, 1], [], []>} : vector<80x32xbf16>, vector<32x128xbf16>, vector<80x128xf32> -> vector<80x128xf32>
    %52 = arith.addf %47, %51 : vector<80x128xf32>
    %c0_48 = arith.constant 0 : index
    %c20 = arith.constant 20 : index
    %c0_49 = arith.constant 0 : index
    %53 = vector.load %arg2[%c0_48, %c20, %c0_49] : memref<1x112x32xbf16, #tpu.memory_space<vmem>>, vector<1x80x32xbf16>
    %54 = vector.shape_cast %53 : vector<1x80x32xbf16> to vector<80x32xbf16>
    %c192 = arith.constant 192 : index
    %c0_50 = arith.constant 0 : index
    %55 = vector.load %arg9[%c192, %c0_50] : memref<288x128xbf16, #tpu.memory_space<vmem>>, vector<32x128xbf16>
    %cst_51 = arith.constant dense<0.000000e+00> : vector<80x128xf32>
    %56 = tpu.matmul %54, %55, %cst_51 {dimension_numbers = #tpu.dot_dimension_numbers<[1], [0], [0], [1], [0, 0, 1, 1], [], []>} : vector<80x32xbf16>, vector<32x128xbf16>, vector<80x128xf32> -> vector<80x128xf32>
    %57 = arith.addf %52, %56 : vector<80x128xf32>
    %c0_52 = arith.constant 0 : index
    %c21 = arith.constant 21 : index
    %c0_53 = arith.constant 0 : index
    %58 = vector.load %arg2[%c0_52, %c21, %c0_53] : memref<1x112x32xbf16, #tpu.memory_space<vmem>>, vector<1x80x32xbf16>
    %59 = vector.shape_cast %58 : vector<1x80x32xbf16> to vector<80x32xbf16>
    %c224 = arith.constant 224 : index
    %c0_54 = arith.constant 0 : index
    %60 = vector.load %arg9[%c224, %c0_54] : memref<288x128xbf16, #tpu.memory_space<vmem>>, vector<32x128xbf16>
    %cst_55 = arith.constant dense<0.000000e+00> : vector<80x128xf32>
    %61 = tpu.matmul %59, %60, %cst_55 {dimension_numbers = #tpu.dot_dimension_numbers<[1], [0], [0], [1], [0, 0, 1, 1], [], []>} : vector<80x32xbf16>, vector<32x128xbf16>, vector<80x128xf32> -> vector<80x128xf32>
    %62 = arith.addf %57, %61 : vector<80x128xf32>
    %c0_56 = arith.constant 0 : index
    %c22 = arith.constant 22 : index
    %c0_57 = arith.constant 0 : index
    %63 = vector.load %arg2[%c0_56, %c22, %c0_57] : memref<1x112x32xbf16, #tpu.memory_space<vmem>>, vector<1x80x32xbf16>
    %64 = vector.shape_cast %63 : vector<1x80x32xbf16> to vector<80x32xbf16>
    %c256 = arith.constant 256 : index
    %c0_58 = arith.constant 0 : index
    %65 = vector.load %arg9[%c256, %c0_58] : memref<288x128xbf16, #tpu.memory_space<vmem>>, vector<32x128xbf16>
    %cst_59 = arith.constant dense<0.000000e+00> : vector<80x128xf32>
    %66 = tpu.matmul %64, %65, %cst_59 {dimension_numbers = #tpu.dot_dimension_numbers<[1], [0], [0], [1], [0, 0, 1, 1], [], []>} : vector<80x32xbf16>, vector<32x128xbf16>, vector<80x128xf32> -> vector<80x128xf32>
    %67 = arith.addf %62, %66 : vector<80x128xf32>
    %c0_60 = arith.constant 0 : index
    %c0_61 = arith.constant 0 : index
    %68 = vector.load %arg10[%c0_60, %c0_61] : memref<1x128xf32, #tpu.memory_space<vmem>>, vector<1x128xf32>
    %69 = vector.broadcast %68 : vector<1x128xf32> to vector<80x128xf32>
    %70 = arith.mulf %67, %69 : vector<80x128xf32>
    %c0_62 = arith.constant 0 : index
    %c0_63 = arith.constant 0 : index
    %71 = vector.load %arg11[%c0_62, %c0_63] : memref<1x128xf32, #tpu.memory_space<vmem>>, vector<1x128xf32>
    %72 = vector.broadcast %71 : vector<1x128xf32> to vector<80x128xf32>
    %73 = arith.addf %70, %72 : vector<80x128xf32>
    %74 = vector.broadcast %23 : vector<1x128xf32> to vector<80x128xf32>
    %75 = arith.mulf %73, %74 : vector<80x128xf32>
    %c0_64 = arith.constant 0 : index
    %c0_65 = arith.constant 0 : index
    %c0_66 = arith.constant 0 : index
    %76 = vector.load %arg3[%c0_64, %c0_65, %c0_66] : memref<1x384x16xbf16, #tpu.memory_space<vmem>>, vector<1x80x16xbf16>
    %77 = vector.shape_cast %76 : vector<1x80x16xbf16> to vector<80x16xbf16>
    %c0_67 = arith.constant 0 : index
    %c0_68 = arith.constant 0 : index
    %78 = vector.load %arg12[%c0_67, %c0_68] : memref<144x128xbf16, #tpu.memory_space<vmem>>, vector<16x128xbf16>
    %cst_69 = arith.constant dense<0.000000e+00> : vector<80x128xf32>
    %79 = tpu.matmul %77, %78, %cst_69 {dimension_numbers = #tpu.dot_dimension_numbers<[1], [0], [0], [1], [0, 0, 1, 1], [], []>} : vector<80x16xbf16>, vector<16x128xbf16>, vector<80x128xf32> -> vector<80x128xf32>
    %c0_70 = arith.constant 0 : index
    %c96_71 = arith.constant 96 : index
    %c0_72 = arith.constant 0 : index
    %80 = vector.load %arg3[%c0_70, %c96_71, %c0_72] : memref<1x384x16xbf16, #tpu.memory_space<vmem>>, vector<1x80x16xbf16>
    %81 = vector.shape_cast %80 : vector<1x80x16xbf16> to vector<80x16xbf16>
    %c16 = arith.constant 16 : index
    %c0_73 = arith.constant 0 : index
    %82 = vector.load %arg12[%c16, %c0_73] : memref<144x128xbf16, #tpu.memory_space<vmem>>, vector<16x128xbf16>
    %cst_74 = arith.constant dense<0.000000e+00> : vector<80x128xf32>
    %83 = tpu.matmul %81, %82, %cst_74 {dimension_numbers = #tpu.dot_dimension_numbers<[1], [0], [0], [1], [0, 0, 1, 1], [], []>} : vector<80x16xbf16>, vector<16x128xbf16>, vector<80x128xf32> -> vector<80x128xf32>
    %84 = arith.addf %79, %83 : vector<80x128xf32>
    %c0_75 = arith.constant 0 : index
    %c1_76 = arith.constant 1 : index
    %c0_77 = arith.constant 0 : index
    %85 = vector.load %arg3[%c0_75, %c1_76, %c0_77] : memref<1x384x16xbf16, #tpu.memory_space<vmem>>, vector<1x80x16xbf16>
    %86 = vector.shape_cast %85 : vector<1x80x16xbf16> to vector<80x16xbf16>
    %c32_78 = arith.constant 32 : index
    %c0_79 = arith.constant 0 : index
    %87 = vector.load %arg12[%c32_78, %c0_79] : memref<144x128xbf16, #tpu.memory_space<vmem>>, vector<16x128xbf16>
    %cst_80 = arith.constant dense<0.000000e+00> : vector<80x128xf32>
    %88 = tpu.matmul %86, %87, %cst_80 {dimension_numbers = #tpu.dot_dimension_numbers<[1], [0], [0], [1], [0, 0, 1, 1], [], []>} : vector<80x16xbf16>, vector<16x128xbf16>, vector<80x128xf32> -> vector<80x128xf32>
    %89 = arith.addf %84, %88 : vector<80x128xf32>
    %c0_81 = arith.constant 0 : index
    %c192_82 = arith.constant 192 : index
    %c0_83 = arith.constant 0 : index
    %90 = vector.load %arg3[%c0_81, %c192_82, %c0_83] : memref<1x384x16xbf16, #tpu.memory_space<vmem>>, vector<1x80x16xbf16>
    %91 = vector.shape_cast %90 : vector<1x80x16xbf16> to vector<80x16xbf16>
    %c48 = arith.constant 48 : index
    %c0_84 = arith.constant 0 : index
    %92 = vector.load %arg12[%c48, %c0_84] : memref<144x128xbf16, #tpu.memory_space<vmem>>, vector<16x128xbf16>
    %cst_85 = arith.constant dense<0.000000e+00> : vector<80x128xf32>
    %93 = tpu.matmul %91, %92, %cst_85 {dimension_numbers = #tpu.dot_dimension_numbers<[1], [0], [0], [1], [0, 0, 1, 1], [], []>} : vector<80x16xbf16>, vector<16x128xbf16>, vector<80x128xf32> -> vector<80x128xf32>
    %94 = arith.addf %89, %93 : vector<80x128xf32>
    %c0_86 = arith.constant 0 : index
    %c288 = arith.constant 288 : index
    %c0_87 = arith.constant 0 : index
    %95 = vector.load %arg3[%c0_86, %c288, %c0_87] : memref<1x384x16xbf16, #tpu.memory_space<vmem>>, vector<1x80x16xbf16>
    %96 = vector.shape_cast %95 : vector<1x80x16xbf16> to vector<80x16xbf16>
    %c64_88 = arith.constant 64 : index
    %c0_89 = arith.constant 0 : index
    %97 = vector.load %arg12[%c64_88, %c0_89] : memref<144x128xbf16, #tpu.memory_space<vmem>>, vector<16x128xbf16>
    %cst_90 = arith.constant dense<0.000000e+00> : vector<80x128xf32>
    %98 = tpu.matmul %96, %97, %cst_90 {dimension_numbers = #tpu.dot_dimension_numbers<[1], [0], [0], [1], [0, 0, 1, 1], [], []>} : vector<80x16xbf16>, vector<16x128xbf16>, vector<80x128xf32> -> vector<80x128xf32>
    %99 = arith.addf %94, %98 : vector<80x128xf32>
    %c0_91 = arith.constant 0 : index
    %c193 = arith.constant 193 : index
    %c0_92 = arith.constant 0 : index
    %100 = vector.load %arg3[%c0_91, %c193, %c0_92] : memref<1x384x16xbf16, #tpu.memory_space<vmem>>, vector<1x80x16xbf16>
    %101 = vector.shape_cast %100 : vector<1x80x16xbf16> to vector<80x16xbf16>
    %c80 = arith.constant 80 : index
    %c0_93 = arith.constant 0 : index
    %102 = vector.load %arg12[%c80, %c0_93] : memref<144x128xbf16, #tpu.memory_space<vmem>>, vector<16x128xbf16>
    %cst_94 = arith.constant dense<0.000000e+00> : vector<80x128xf32>
    %103 = tpu.matmul %101, %102, %cst_94 {dimension_numbers = #tpu.dot_dimension_numbers<[1], [0], [0], [1], [0, 0, 1, 1], [], []>} : vector<80x16xbf16>, vector<16x128xbf16>, vector<80x128xf32> -> vector<80x128xf32>
    %104 = arith.addf %99, %103 : vector<80x128xf32>
    %c0_95 = arith.constant 0 : index
    %c10_96 = arith.constant 10 : index
    %c0_97 = arith.constant 0 : index
    %105 = vector.load %arg3[%c0_95, %c10_96, %c0_97] : memref<1x384x16xbf16, #tpu.memory_space<vmem>>, vector<1x80x16xbf16>
    %106 = vector.shape_cast %105 : vector<1x80x16xbf16> to vector<80x16xbf16>
    %c96_98 = arith.constant 96 : index
    %c0_99 = arith.constant 0 : index
    %107 = vector.load %arg12[%c96_98, %c0_99] : memref<144x128xbf16, #tpu.memory_space<vmem>>, vector<16x128xbf16>
    %cst_100 = arith.constant dense<0.000000e+00> : vector<80x128xf32>
    %108 = tpu.matmul %106, %107, %cst_100 {dimension_numbers = #tpu.dot_dimension_numbers<[1], [0], [0], [1], [0, 0, 1, 1], [], []>} : vector<80x16xbf16>, vector<16x128xbf16>, vector<80x128xf32> -> vector<80x128xf32>
    %109 = arith.addf %104, %108 : vector<80x128xf32>
    %c0_101 = arith.constant 0 : index
    %c106 = arith.constant 106 : index
    %c0_102 = arith.constant 0 : index
    %110 = vector.load %arg3[%c0_101, %c106, %c0_102] : memref<1x384x16xbf16, #tpu.memory_space<vmem>>, vector<1x80x16xbf16>
    %111 = vector.shape_cast %110 : vector<1x80x16xbf16> to vector<80x16xbf16>
    %c112 = arith.constant 112 : index
    %c0_103 = arith.constant 0 : index
    %112 = vector.load %arg12[%c112, %c0_103] : memref<144x128xbf16, #tpu.memory_space<vmem>>, vector<16x128xbf16>
    %cst_104 = arith.constant dense<0.000000e+00> : vector<80x128xf32>
    %113 = tpu.matmul %111, %112, %cst_104 {dimension_numbers = #tpu.dot_dimension_numbers<[1], [0], [0], [1], [0, 0, 1, 1], [], []>} : vector<80x16xbf16>, vector<16x128xbf16>, vector<80x128xf32> -> vector<80x128xf32>
    %114 = arith.addf %109, %113 : vector<80x128xf32>
    %c0_105 = arith.constant 0 : index
    %c11_106 = arith.constant 11 : index
    %c0_107 = arith.constant 0 : index
    %115 = vector.load %arg3[%c0_105, %c11_106, %c0_107] : memref<1x384x16xbf16, #tpu.memory_space<vmem>>, vector<1x80x16xbf16>
    %116 = vector.shape_cast %115 : vector<1x80x16xbf16> to vector<80x16xbf16>
    %c128_108 = arith.constant 128 : index
    %c0_109 = arith.constant 0 : index
    %117 = vector.load %arg12[%c128_108, %c0_109] : memref<144x128xbf16, #tpu.memory_space<vmem>>, vector<16x128xbf16>
    %cst_110 = arith.constant dense<0.000000e+00> : vector<80x128xf32>
    %118 = tpu.matmul %116, %117, %cst_110 {dimension_numbers = #tpu.dot_dimension_numbers<[1], [0], [0], [1], [0, 0, 1, 1], [], []>} : vector<80x16xbf16>, vector<16x128xbf16>, vector<80x128xf32> -> vector<80x128xf32>
    %119 = arith.addf %114, %118 : vector<80x128xf32>
    %c0_111 = arith.constant 0 : index
    %c0_112 = arith.constant 0 : index
    %120 = vector.load %arg13[%c0_111, %c0_112] : memref<1x128xf32, #tpu.memory_space<vmem>>, vector<1x128xf32>
    %121 = vector.broadcast %120 : vector<1x128xf32> to vector<80x128xf32>
    %122 = arith.mulf %119, %121 : vector<80x128xf32>
    %c0_113 = arith.constant 0 : index
    %c0_114 = arith.constant 0 : index
    %123 = vector.load %arg14[%c0_113, %c0_114] : memref<1x128xf32, #tpu.memory_space<vmem>>, vector<1x128xf32>
    %124 = vector.broadcast %123 : vector<1x128xf32> to vector<80x128xf32>
    %125 = arith.addf %122, %124 : vector<80x128xf32>
    %126 = arith.addf %125, %75 : vector<80x128xf32>
    %cst_115 = arith.constant 0.000000e+00 : f32
    %127 = vector.broadcast %cst_115 : f32 to vector<80x128xf32>
    %128 = arith.maximumf %126, %127 : vector<80x128xf32>
    %c0_116 = arith.constant 0 : index
    %c0_117 = arith.constant 0 : index
    %c0_118 = arith.constant 0 : index
    %129 = vector.load %arg15[%c0_116, %c0_117, %c0_118] : memref<1x80x128xf32, #tpu.memory_space<vmem>>, vector<1x80x128xf32>
    %130 = vector.shape_cast %129 : vector<1x80x128xf32> to vector<80x128xf32>
    %131 = vector.shape_cast %128 : vector<80x128xf32> to vector<1x80x128xf32>
    tpu.vector_store %arg15[%c0_116, %c0_117, %c0_118], %131 {strides = array<i32>} : memref<1x80x128xf32, #tpu.memory_space<vmem>>, vector<1x80x128xf32>,
    return
  }
  func.func @transform_0(%arg0: i32) -> (i32, i32, i32) {
    %c0_i32 = arith.constant 0 : i32
    %c0_i32_0 = arith.constant 0 : i32
    %c0_i32_1 = arith.constant 0 : i32
    return %arg0, %c0_i32, %c0_i32_0 : i32, i32, i32
  }
  func.func @transform_1(%arg0: i32) -> (i32, i32, i32) {
    %c0_i32 = arith.constant 0 : i32
    %c0_i32_0 = arith.constant 0 : i32
    %c0_i32_1 = arith.constant 0 : i32
    return %arg0, %c0_i32, %c0_i32_0 : i32, i32, i32
  }
  func.func @transform_2(%arg0: i32) -> (i32, i32, i32) {
    %c0_i32 = arith.constant 0 : i32
    %c0_i32_0 = arith.constant 0 : i32
    %c0_i32_1 = arith.constant 0 : i32
    return %arg0, %c0_i32, %c0_i32_0 : i32, i32, i32
  }
  func.func @transform_3(%arg0: i32) -> (i32, i32) {
    %c0_i32 = arith.constant 0 : i32
    %c0_i32_0 = arith.constant 0 : i32
    %c0_i32_1 = arith.constant 0 : i32
    return %c0_i32, %c0_i32_0 : i32, i32
  }
  func.func @transform_4(%arg0: i32) -> (i32, i32) {
    %c0_i32 = arith.constant 0 : i32
    %c0_i32_0 = arith.constant 0 : i32
    %c0_i32_1 = arith.constant 0 : i32
    return %c0_i32, %c0_i32_0 : i32, i32
  }
  func.func @transform_5(%arg0: i32) -> (i32, i32) {
    %c0_i32 = arith.constant 0 : i32
    %c0_i32_0 = arith.constant 0 : i32
    %c0_i32_1 = arith.constant 0 : i32
    return %c0_i32, %c0_i32_0 : i32, i32
  }
  func.func @transform_6(%arg0: i32) -> (i32, i32) {
    %c0_i32 = arith.constant 0 : i32
    %c0_i32_0 = arith.constant 0 : i32
    %c0_i32_1 = arith.constant 0 : i32
    return %c0_i32, %c0_i32_0 : i32, i32
  }
  func.func @transform_7(%arg0: i32) -> (i32, i32) {
    %c0_i32 = arith.constant 0 : i32
    %c0_i32_0 = arith.constant 0 : i32
    %c0_i32_1 = arith.constant 0 : i32
    return %c0_i32, %c0_i32_0 : i32, i32
  }
  func.func @transform_8(%arg0: i32) -> (i32, i32) {
    %c0_i32 = arith.constant 0 : i32
    %c0_i32_0 = arith.constant 0 : i32
    %c0_i32_1 = arith.constant 0 : i32
    return %c0_i32, %c0_i32_0 : i32, i32
  }
  func.func @transform_9(%arg0: i32) -> (i32, i32) {
    %c0_i32 = arith.constant 0 : i32
    %c0_i32_0 = arith.constant 0 : i32
    %c0_i32_1 = arith.constant 0 : i32
    return %c0_i32, %c0_i32_0 : i32, i32
  }
  func.func @transform_10(%arg0: i32) -> (i32, i32) {
    %c0_i32 = arith.constant 0 : i32
    %c0_i32_0 = arith.constant 0 : i32
    %c0_i32_1 = arith.constant 0 : i32
    return %c0_i32, %c0_i32_0 : i32, i32
  }
  func.func @transform_11(%arg0: i32) -> (i32, i32) {
    %c0_i32 = arith.constant 0 : i32
    %c0_i32_0 = arith.constant 0 : i32
    %c0_i32_1 = arith.constant 0 : i32
    return %c0_i32, %c0_i32_0 : i32, i32
  }
  func.func @transform_12(%arg0: i32) -> (i32, i32) {
    %c0_i32 = arith.constant 0 : i32
    %c0_i32_0 = arith.constant 0 : i32
    %c0_i32_1 = arith.constant 0 : i32
    return %c0_i32, %c0_i32_0 : i32, i32
  }
  func.func @transform_13(%arg0: i32) -> (i32, i32) {
    %c0_i32 = arith.constant 0 : i32
    %c0_i32_0 = arith.constant 0 : i32
    %c0_i32_1 = arith.constant 0 : i32
    return %c0_i32, %c0_i32_0 : i32, i32
  }
  func.func @transform_14(%arg0: i32) -> (i32, i32, i32) {
    %c0_i32 = arith.constant 0 : i32
    %c0_i32_0 = arith.constant 0 : i32
    %c0_i32_1 = arith.constant 0 : i32
    return %arg0, %c0_i32, %c0_i32_0 : i32, i32, i32
  }
}

</mosaic_0001>

<bundles_post_ra>
// kernel: render_trans_forward.1
= control target key start
LH: loop header
LB: loop body
LE: loop exit
PB: predicated region body
PF: predicated region fallthrough
CT: control target
= control target key end

     0   :  { %s4890_s29 = smov 0   ;;  %s6309_s0 = inlined_call_operand.vmem [shape: f32[2,1,16], index: 0, kind: input, shape index: {}]   ;;  %s6310_s1 = inlined_call_operand.vmem [shape: bf16[2,112,32], index: 1, kind: input, shape index: {}]   ;;  %s6311_s2 = inlined_call_operand.vmem [shape: bf16[2,384,16], index: 2, kind: input, shape index: {}]   ;;  %s6312_s3 = inlined_call_operand.vmem [shape: f32[16,128], index: 3, kind: input, shape index: {}]   ;;  %s6313_s4 = inlined_call_operand.vmem [shape: f32[1,128], index: 4, kind: input, shape index: {}]   ;;  %s6314_s5 = inlined_call_operand.vmem [shape: f32[1,128], index: 5, kind: input, shape index: {}]   ;;  %s6315_s6 = inlined_call_operand.vmem [shape: f32[128,16], index: 6, kind: input, shape index: {}]   ;;  %s6316_s7 = inlined_call_operand.vmem [shape: f32[16,128], index: 7, kind: input, shape index: {}]   ;;  %s6317_s8 = inlined_call_operand.vmem [shape: bf16[288,128], index: 8, kind: input, shape index: {}]   ;;  %s6318_s9 = inlined_call_operand.vmem [shape: f32[1,128], index: 9, kind: input, shape index: {}]   ;;  %s6319_s10 = inlined_call_operand.vmem [shape: f32[1,128], index: 10, kind: input, shape index: {}]   ;;  %s6320_s11 = inlined_call_operand.vmem [shape: bf16[144,128], index: 11, kind: input, shape index: {}]   ;;  %s6321_s12 = inlined_call_operand.vmem [shape: f32[1,128], index: 12, kind: input, shape index: {}]   ;;  %s6322_s13 = inlined_call_operand.vmem [shape: f32[1,128], index: 13, kind: input, shape index: {}]   ;;  %s6323_s14 = inlined_call_operand.vmem [shape: f32[2,80,128], index: 14, kind: output, shape index: {}]  }
   0x1 LB: > { %s3828_s30 = sadd.s32 4294967295, %s4811_s29   ;;  %p3832_p0 = scmp.ge.s32.totalorder %s4811_s29, 1  ;;  %s4811_s29 = sphi %s4890_s29, %s24_s29  }
   0x2   : > { %p430_p1 = scmp.lt.s32.totalorder %s4811_s29, 3 }
   0x4   : > { %p431_p2 = pnand %p3832_p0, %p430_p1 }
   0x6   : > { %434 = sbr.rel (%p431_p2) target bundleno = 1363 (0x553), region = 76 }
   0xb   : > { %v505_v0 = vld [vmem:[%s6312_s3 + $0x8] sm:$0xff]  ;;  %p484_p3 = scmp.lt.s32.totalorder %s3828_s30, 1  ;;  %v6324_v1 = vmov 0.0   ;;  %v504_v2 = vld [vmem:[%s6312_s3] sm:$0xff]  ;;  %vm4814_vm0 = vmmov 0   ;;  %v4910_v3 = vld [vmem:[%s6315_s6 + $0x78] sm:$0xff] }
   0xc   : > { %4190 = vmatprep.subr.mxu0 %v6324_v1  ;;  %4194 = vmatprep.mubr.msk.f32.mxu0 %vm4814_vm0, %v6324_v1  ;;  %v4918_v4 = vld [vmem:[%s6315_s6 + $0x70] sm:$0xff]  ;;  %vm506_vm1 = vcmask 130048   ;;  %v4931_v5 = vld [vmem:[%s6315_s6 + $0x68] sm:$0xff]  ;;  %v4937_v7 = vld [vmem:[%s6315_s6 + $0x60] sm:$0xff]  ;;  %vm997_vm2 = vcmask 261120   ;;  %vm1189_vm4 = vcmask 1046528  }
   0xd   : > { %4191 = vmatpush3.msra.mxu0 %v505_v0  ;;  %s6374_s30 = smov (!%p484_p3, %s3828_s30), 1  ;;  %4197 = vmatprep.subr.mxu1 %v6324_v1  ;;  %v4947_v8 = vld [vmem:[%s6315_s6 + $0x58] sm:$0xff]  ;;  %v4960_v9 = vld [vmem:[%s6315_s6 + $0x50] sm:$0xff]  ;;  %v4969_v10 = vld [vmem:[%s6315_s6 + $0x48] sm:$0xff]  ;;  %vm940_vm3 = vsmask.f32 7424 }
   0xe   : > { %4192 = vmatprep.subr.mxu0 %v6324_v1  ;;  %4198 = vmatpush3.msra.mxu1 %v4910_v3  ;;  %s486_s25 = scalar_lea.vmem %s6309_s0, %s6374_s30  ;;  %s4695_s26 = smul.u32 56, %s6374_s30  ;;  %v4976_v11 = vld [vmem:[%s6315_s6 + $0x40] sm:$0xff]  ;;  %v587_v12 = vld [vmem:[%s6315_s6 + $0x38] sm:$0xff]  ;;  %v586_v13 = vld [vmem:[%s6315_s6 + $0x30] sm:$0xff]  ;;  %vm1655_vm5 = vcmask 1045504   ;;  %vm2121_vm8 = vcmask 1044480  }
   0xf   : > { %4193 = vmatpush3.msra.mxu0 %v504_v2  ;;  %4199 = vmatprep.subr.mxu1 %v6324_v1  ;;  %v503_v6 = vld [vmem:[%s486_s25] sm:$0x1]  ;;  %s4696_s17 = smul.u32 192, %s6374_s30  ;;  %v585_v14 = vld [vmem:[%s6315_s6 + $0x28] sm:$0xff]  ;;  %v583_v16 = vld [vmem:[%s6315_s6 + $0x18] sm:$0xff] }
  0x10   : > { %4200 = vmatpush3.msra.mxu1 %v4918_v4  ;;  %4229 = vmatprep.mubr.msk.f32.mxu1 %vm4814_vm0, %v6324_v1  ;;  %s4954_s22 = scalar_lea.vmem %s6310_s1, %s4695_s26  ;;  %v584_v15 = vld [vmem:[%s6315_s6 + $0x20] sm:$0xff]  ;;  %v582_v17 = vld [vmem:[%s6315_s6 + $0x10] sm:$0xff]  ;;  %v581_v18 = vld [vmem:[%s6315_s6 + $0x8] sm:$0xff]  ;;  %vm1483_vm6 = vsmask.f32 6400  ;;  %s4697_s16 = smul.u32 80, %s6374_s30 }
  0x11   : > { %4195 = vmatmul.mubr.msk.f32.vlgmr.msra.gmra.mxu0 %vm506_vm1, %v503_v6  ;;  %4201 = vmatprep.subr.mxu1 %v6324_v1  ;;  %s5014_s20 = scalar_lea.vmem %s6311_s2, %s4696_s17  ;;  %v580_v19 = vld [vmem:[%s6315_s6] sm:$0xff]  ;;  %v667_v20 = vld [vmem:[%s6316_s7 + $0x8] sm:$0xff]  ;;  %v4715_v43 = vld [vmem:[%s6317_s8 + $0x38] sm:$0xff]   ;;  %vm1949_vm7 = vsmask.f32 5376 }
  0x12   : > { %4202 = vmatpush3.msra.mxu1 %v4931_v5  ;;  %4232 = vmatprep.subr.mxu0 %v6324_v1  ;;  %v666_v23 = vld [vmem:[%s6316_s7] sm:$0xff]  ;;  %v4708_v29 = vld [vmem:[%s6317_s8 + $0x8] sm:$0xff]   ;;  %v4716_v44 = vld [vmem:[%s4954_s22 + $0x10] sm:$0xff]   ;;  %s6240_s30 = scalar_lea.vmem %s6323_s14, %s4697_s16 }
  0x13   : > { %4203 = vmatprep.subr.mxu1 %v6324_v1  ;;  %4236 = vmatprep.mubr.msk.f32.mxu0 %vm4814_vm0, %v6324_v1  ;;  %v893_v31 = vld [vmem:[%s4954_s22] sm:$0xf]  ;;  %v894_v32 = vld [vmem:[%s4954_s22 + $0x4] sm:$0xf]  ;;  %v5078_v35 = vld [vmem:[%s4954_s22 + $0x8] sm:$0xff]   ;;  %v957_v47 = vshll.u32 %v4716_v44, 16 }
  0x14   : > { %4204 = vmatpush3.msra.mxu1 %v4937_v7  ;;  %4233 = vmatpush3.msra.mxu0 %v667_v20  ;;  %v4710_v33 = vld [vmem:[%s6317_s8] sm:$0xff]   ;;  %v3839_v34 = vcombine.low %v893_v31, %v894_v32  ;;  %v949_v39 = vshll.u32 %v5078_v35, 16  ;;  %v953_v45 = vshrl.u32 %v5078_v35, 16  ;;  %v4717_v50 = vld [vmem:[%s4954_s22 + $0x18] sm:$0xff]   ;;  %v961_v51 = vshrl.u32 %v4716_v44, 16  ;;  %v4719_v56 = vld [vmem:[%s6317_s8 + $0x30] sm:$0xff]  }
  0x15   : > { %4205 = vmatprep.subr.mxu1 %v6324_v1  ;;  %4234 = vmatprep.subr.mxu0 %v6324_v1  ;;  %v959_v48 = vrot.slane %v957_v47, 1  ;;  %v965_v53 = vshll.u32 %v4717_v50, 16  ;;  %v5112_v57 = vld [vmem:[%s4954_s22 + $0x20] sm:$0xff]   ;;  %v969_v58 = vshrl.u32 %v4717_v50, 16  ;;  %v1312_v0 = vld [vmem:[%s4954_s22 + $0x8] sm:$0xf] }
  0x16   : > { %4206 = vmatpush3.msra.mxu1 %v4947_v8  ;;  %4235 = vmatpush3.msra.mxu0 %v666_v23  ;;  %v944_v36 = vshll.u32 %v3839_v34, 16  ;;  %v942_v37 = vshrl.u32 %v3839_v34, 16  ;;  %v951_v41 = vrot.slane %v949_v39, 1  ;;  %v973_v60 = vshll.u32 %v5112_v57, 16  ;;  %v1311_v63 = vld [vmem:[%s4954_s22 + $0x4] sm:$0xe] }
  0x17   : > { %4207 = vmatprep.subr.mxu1 %v6324_v1  ;;  %4239 = vmatprep.subr.mxu0 %v6324_v1  ;;  %v963_v52 = vor.u32 %v961_v51, %v959_v48  ;;  %v967_v54 = vrot.slane %v965_v53, 1  ;;  %v3867_v2 = vcombine.low %v1311_v63, %v1312_v0  ;;  %v1181_v6 = vld [vmem:[%s4954_s22] sm:$0xe]  ;;  %v4735_v51 = vld [vmem:[%s6317_s8 + $0x78] sm:$0xff]  }
  0x18   : > { %4208 = vmatpush3.msra.mxu1 %v4960_v9  ;;  %v946_v38 = vrot.slane %v944_v36, 1  ;;  %v955_v46 = vor.u32 %v953_v45, %v951_v41  ;;  %v5117_v61 = vrot.slane %v973_v60, 1 }
  0x19   : > { %4209 = vmatprep.subr.mxu1 %v6324_v1  ;;  %v5106_v55 = vsel %vm940_vm3, %v963_v52, %v967_v54  ;;  %v971_v59 = vor.u32 %v969_v58, %v967_v54 }
  0x1a   : > { %4210 = vmatpush3.msra.mxu1 %v4969_v10  ;;  %v947_v40 = vor.u32 %v946_v38, %v942_v37  ;;  %v5099_v49 = vsel %vm940_vm3, %v955_v46, %v959_v48  ;;  %v1485_v37 = vshrl.u32 %v3867_v2, 16  ;;  %v1488_v38 = vshll.u32 %v3867_v2, 16 }
  0x1b   : > { %4211 = vmatprep.subr.mxu1 %v6324_v1  ;;  %v5123_v62 = vsel %vm940_vm3, %v971_v59, %v5117_v61 }
  0x1c   : > { %4212 = vmatpush3.msra.mxu1 %v4976_v11  ;;  %v5086_v42 = vsel %vm940_vm3, %v947_v40, %v951_v41 }
  0x1d   : > { %4213 = vmatprep.subr.mxu1 %v6324_v1 }
  0x1e   : > { %4214 = vmatpush3.msra.mxu1 %v587_v12 }
  0x1f   : > { %4215 = vmatprep.subr.mxu1 %v6324_v1 }
  0x20   : > { %4216 = vmatpush3.msra.mxu1 %v586_v13 }
  0x21   : > { %4217 = vmatprep.subr.mxu1 %v6324_v1 }
  0x22   : > { %4218 = vmatpush3.msra.mxu1 %v585_v14 }
  0x23   : > { %4219 = vmatprep.subr.mxu1 %v6324_v1 }
  0x24   : > { %4220 = vmatpush3.msra.mxu1 %v584_v15 }
  0x25   : > { %4221 = vmatprep.subr.mxu1 %v6324_v1 }
  0x26   : > { %4222 = vmatpush3.msra.mxu1 %v583_v16 }
  0x27   : > { %4223 = vmatprep.subr.mxu1 %v6324_v1 }
  0x28   : > { %4224 = vmatpush3.msra.mxu1 %v582_v17 }
  0x29   : > { %4225 = vmatprep.subr.mxu1 %v6324_v1 }
  0x2a   : > { %4226 = vmatpush3.msra.mxu1 %v581_v18 }
  0x2b   : > { %4227 = vmatprep.subr.mxu1 %v6324_v1 }
  0x2c   : > { %4228 = vmatpush3.msra.mxu1 %v580_v19 }
  0x2d   : > { %4274 = vmatprep.subr.mxu1 %v6324_v1 }
  0xd1   : > { %v576_v21 = vpop.f32.mrf.mxu0 }
  0xd2   : > { %4230 = vmatmul.mubr.f32.vlgmr.msra.gmra.mxu1 %v576_v21 }
  0xd3   : > { %v4196_v22 = vpop.f32.mrf.mxu0  ;;  %4275 = vmatpush3.msra.mxu1 %v667_v20  ;;  %4278 = vmatprep.mubr.msk.f32.mxu1 %vm4814_vm0, %v6324_v1  ;;  %v1195_v20 = vrot.slane %v4717_v50, 1 }
  0xd4   : > { %4276 = vmatprep.subr.mxu1 %v6324_v1 }
  0xd5   : > { %4277 = vmatpush3.msra.mxu1 %v666_v23  ;;  %v5171_v23 = vld [vmem:[%s4954_s22 + $0x24] sm:$0xff]  }
  0xd6   : > { %4281 = vmatprep.subr.bf16.mxu1 %v6324_v1 }
 0x192   : > { %v662_v24 = vpop.f32.mrf.mxu1 }
 0x193   : > { %4237 = vmatmul.mubr.msk.f32.vlgmr.msra.gmra.mxu0 %vm506_vm1, %v662_v24  ;;  %v1361_v24 = vrot.slane %v5171_v23, 1 }
 0x194   : > { %v4231_v25 = vpop.f32.mrf.mxu1  ;;  %4240 = vmatpush3.msra.mxu0 %v4910_v3  ;;  %4271 = vmatprep.mubr.msk.f32.mxu0 %vm4814_vm0, %v6324_v1  ;;  %v5132_v3 = vld [vmem:[%s4954_s22 + $0xc] sm:$0xff]  }
 0x195   : > { %4241 = vmatprep.subr.mxu0 %v6324_v1  ;;  %v4731_v25 = vld [vmem:[%s6317_s8 + $0x50] sm:$0xff]   ;;  %v1493_v39 = vshrl.u32 %v5132_v3, 16  ;;  %v1496_v40 = vshll.u32 %v5132_v3, 16 }
 0x196   : > { %4242 = vmatpush3.msra.mxu0 %v4918_v4  ;;  %v1354_v4 = vrot.slane %v3867_v2, 1 }
 0x197   : > { %4243 = vmatprep.subr.mxu0 %v6324_v1  ;;  %v1495_v45 = vrot.slane %v1493_v39, 1  ;;  %v1498_v46 = vrot.slane %v1496_v40, 2 }
 0x198   : > { %4244 = vmatpush3.msra.mxu0 %v4931_v5  ;;  %v1355_v5 = vrot.slane %v5132_v3, 1 }
 0x199   : > { %4245 = vmatprep.subr.mxu0 %v6324_v1  ;;  %v1499_v48 = vor.u32 %v1498_v46, %v1495_v45 }
 0x19a   : > { %4246 = vmatpush3.msra.mxu0 %v4937_v7  ;;  %v3859_v7 = vcombine.low %v1181_v6, %v894_v32 }
 0x19b   : > { %4247 = vmatprep.subr.mxu0 %v6324_v1 }
 0x19c   : > { %4248 = vmatpush3.msra.mxu0 %v4947_v8  ;;  %v1191_v8 = vrot.slane %v5078_v35, 1 }
 0x19d   : > { %4249 = vmatprep.subr.mxu0 %v6324_v1 }
 0x19e   : > { %4250 = vmatpush3.msra.mxu0 %v4960_v9  ;;  %v1356_v9 = vsel %vm1189_vm4, %v1354_v4, %v1355_v5 }
 0x19f   : > { %4251 = vmatprep.subr.mxu0 %v6324_v1 }
 0x1a0   : > { %4252 = vmatpush3.msra.mxu0 %v4969_v10  ;;  %v1190_v10 = vrot.slane %v3859_v7, 1 }
 0x1a1   : > { %4253 = vmatprep.subr.mxu0 %v6324_v1 }
 0x1a2   : > { %4254 = vmatpush3.msra.mxu0 %v4976_v11  ;;  %v5142_v11 = vsel %vm1189_vm4, %v1190_v10, %v1191_v8  ;;  %v4737_v10 = vld [vmem:[%s6317_s8 + $0x70] sm:$0xff]  }
 0x1a3   : > { %4255 = vmatprep.subr.mxu0 %v6324_v1 }
 0x1a4   : > { %4256 = vmatpush3.msra.mxu0 %v587_v12  ;;  %v5145_v12 = vld [vmem:[%s4954_s22 + $0x14] sm:$0xff]  }
 0x1a5   : > { %4257 = vmatprep.subr.mxu0 %v6324_v1  ;;  %v1659_v52 = vrot.slane %v5145_v12, 2  ;;  %v1502_v53 = vshrl.u32 %v5145_v12, 16  ;;  %v1505_v54 = vshll.u32 %v5145_v12, 16 }
 0x1a6   : > { %4258 = vmatpush3.msra.mxu0 %v586_v13  ;;  %v4726_v13 = vld [vmem:[%s6317_s8 + $0x58] sm:$0xff]  }
 0x1a7   : > { %4259 = vmatprep.subr.mxu0 %v6324_v1  ;;  %v1504_v58 = vrot.slane %v1502_v53, 1  ;;  %v1507_v59 = vrot.slane %v1505_v54, 2  ;;  %v5265_v53 = vld [vmem:[%s4954_s22 + $0x18] sm:$0xff]  }
 0x1a8   : > { %4260 = vmatpush3.msra.mxu0 %v585_v14  ;;  %v1357_v14 = vrot.slane %v5145_v12, 1  ;;  %v1520_v12 = vshrl.u32 %v5171_v23, 16 }
 0x1a9   : > { %4261 = vmatprep.subr.mxu0 %v6324_v1  ;;  %v1508_v60 = vor.u32 %v1507_v59, %v1504_v58  ;;  %v1968_v58 = vshrl.u32 %v5265_v53, 16  ;;  %v1971_v59 = vshll.u32 %v5265_v53, 16 }
 0x1aa   : > { %4262 = vmatpush3.msra.mxu0 %v584_v15  ;;  %v1193_v15 = vrot.slane %v4716_v44, 1 }
 0x1ab   : > { %4263 = vmatprep.subr.mxu0 %v6324_v1  ;;  %v5216_v63 = vsel %vm1483_vm6, %v1499_v48, %v1508_v60 }
 0x1ac   : > { %4264 = vmatpush3.msra.mxu0 %v583_v16  ;;  %v1358_v16 = vsel %vm1189_vm4, %v1355_v5, %v1357_v14  ;;  %v5165_v22 = vsel %vm1189_vm4, %v1193_v15, %v1195_v20 }
 0x1ad   : > { %4265 = vmatprep.subr.mxu0 %v6324_v1 }
 0x1ae   : > { %4266 = vmatpush3.msra.mxu0 %v582_v17  ;;  %v5153_v17 = vsel %vm1189_vm4, %v1191_v8, %v1193_v15  ;;  %v1522_v15 = vrot.slane %v1520_v12, 1  ;;  %v5292_v12 = vld [vmem:[%s4954_s22 + $0x20] sm:$0xff]  }
 0x1af   : > { %4267 = vmatprep.subr.mxu0 %v6324_v1 }
 0x1b0   : > { %4268 = vmatpush3.msra.mxu0 %v581_v18  ;;  %v5160_v18 = vld [vmem:[%s4954_s22 + $0x1c] sm:$0xff]  }
 0x1b1   : > { %4269 = vmatprep.subr.mxu0 %v6324_v1  ;;  %v1511_v2 = vshrl.u32 %v5160_v18, 16 }
 0x1b2   : > { %4270 = vmatpush3.msra.mxu0 %v580_v19  ;;  %v1359_v19 = vrot.slane %v5160_v18, 1 }
 0x1b3   : > { %4305 = vmatprep.subr.bf16.mxu0 %v6324_v1  ;;  %v1513_v5 = vrot.slane %v1511_v2, 1  ;;  %v1973_v2 = vrot.slane %v1971_v59, 3 }
 0x253   : > { %v737_v26 = vpop.f32.mrf.mxu0 }
 0x254   : > { %v5062_v27 = vsub.f32 %v576_v21, %v737_v26  ;;  %v1360_v21 = vsel %vm1189_vm4, %v1357_v14, %v1359_v19  ;;  %v1197_v26 = vrot.slane %v5112_v57, 1 }
 0x255   : > { %v4238_v28 = vpop.f32.mrf.mxu0 }
 0x256   : > { %v742_v30 = vmul.f32 %v5062_v27, %v5062_v27  ;;  %v1362_v28 = vsel %vm1189_vm4, %v1359_v19, %v1361_v24 }
 0x258   : > { %4272 = vmatmul.mubr.f32.vlgmr.msra.gmra.mxu0 %v742_v30  ;;  %v4732_v30 = vld [vmem:[%s4954_s22 + $0x2c] ss:$0 sps:$4 sm:$0x11]  }
 0x259   : > { %4306 = vmatpush3.bf16.msra.mxu0 %v4708_v29  ;;  %4309 = vmatprep.mubr.msk.bf16.mxu0 %vm4814_vm0, %v6324_v1  ;;  %v5182_v29 = vsel %vm1189_vm4, %v1195_v20, %v1197_v26  ;;  %v1363_v31 = vrot.slane %v4732_v30, 1  ;;  %v4738_v20 = vld [vmem:[%s4954_s22 + $0x2c] ss:$0 sps:$4 sm:$0x33]  }
 0x25a   : > { %4307 = vmatprep.subr.bf16.mxu0 %v6324_v1 }
 0x25b   : > { %v1364_v32 = vsel %vm1189_vm4, %v1361_v24, %v1363_v31  ;;  %v1532_v24 = vshll.u32 %v4738_v20, 16 }
 0x25d   : > { %4308 = vmatpush3.bf16.msra.mxu0 %v4710_v33  ;;  %v1647_v33 = vld [vmem:[%s4954_s22 + $0x4] sm:$0xc] }
 0x25e   : > { %4353 = vmatprep.subr.bf16.mxu0 %v6324_v1 }
 0x260   : > { %4310 = vmatmul.mubr.msk.bf16.vlgmr.msra.gmra.mxu0 %vm997_vm2, %v3839_v34  ;;  %v3888_v34 = vcombine.low %v1647_v33, %v1312_v0  ;;  %v1661_v0 = vrot.slane %v5160_v18, 2 }
 0x261   : > { %4313 = vmatprep.mubr.msk.bf16.mxu0 %vm4814_vm0, %v6324_v1  ;;  %4354 = vmatpush3.bf16.msra.mxu0 %v4715_v43  ;;  %v1487_v43 = vrot.slane %v1485_v37, 1 }
 0x262   : > { %4355 = vmatprep.subr.bf16.mxu0 %v6324_v1  ;;  %v1656_v36 = vrot.slane %v3888_v34, 2  ;;  %v1662_v4 = vsel %vm1655_vm5, %v1659_v52, %v1661_v0  ;;  %v5250_v34 = vld [vmem:[%s4954_s22 + $0x10] sm:$0xff]  }
 0x263   : > { %v1962_v39 = vshll.u32 %v5250_v34, 16 }
 0x265   : > { %4356 = vmatpush3.bf16.msra.mxu0 %v4719_v56  ;;  %v1964_v45 = vrot.slane %v1962_v39, 3  ;;  %v5338_v39 = vld [vmem:[%s4954_s22 + $0x30] ss:$0 sps:$4 sm:$0x77]  }
 0x266   : > { %4401 = vmatprep.subr.bf16.mxu0 %v6324_v1 }
 0x268   : > { %4314 = vmatmul.mubr.msk.bf16.gmra.mxu0 %vm997_vm2, %v5078_v35  ;;  %v1657_v35 = vrot.slane %v5132_v3, 2  ;;  %v1514_v3 = vshll.u32 %v5160_v18, 16 }
 0x269   : > { %4317 = vmatprep.mubr.msk.bf16.mxu0 %vm4814_vm0, %v6324_v1 }
 0x26a   : > { %v1658_v41 = vsel %vm1655_vm5, %v1656_v36, %v1657_v35  ;;  %v1660_v56 = vsel %vm1655_vm5, %v1657_v35, %v1659_v52  ;;  %v1516_v6 = vrot.slane %v1514_v3, 2 }
 0x26c   : > { %v1517_v7 = vor.u32 %v1516_v6, %v1513_v5  ;;  %v4742_v5 = vld [vmem:[%s6320_s11 + $0x8] sm:$0xff]  }
 0x26e   : > { %v5226_v8 = vsel %vm1483_vm6, %v1508_v60, %v1517_v7 }
 0x270   : > { %4318 = vmatmul.mubr.msk.bf16.gmra.mxu0 %vm997_vm2, %v4716_v44  ;;  %v1490_v44 = vrot.slane %v1488_v38, 2  ;;  %v1959_v38 = vshrl.u32 %v5250_v34, 16 }
 0x271   : > { %4321 = vmatprep.mubr.msk.bf16.mxu0 %vm4814_vm0, %v6324_v1 }
 0x272   : > { %v1491_v47 = vor.u32 %v1490_v44, %v1487_v43  ;;  %v1961_v44 = vrot.slane %v1959_v38, 2 }
 0x278   : > { %4322 = vmatmul.mubr.msk.bf16.gmra.mxu0 %vm997_vm2, %v4717_v50  ;;  %v5202_v50 = vsel %vm1483_vm6, %v1491_v47, %v1499_v48  ;;  %v1821_v48 = vrot.slane %v5250_v34, 2 }
 0x279   : > { %4325 = vmatprep.mubr.msk.bf16.mxu0 %vm4814_vm0, %v6324_v1 }
 0x280   : > { %4326 = vmatmul.mubr.msk.bf16.gmra.mxu0 %vm997_vm2, %v5112_v57 }
 0x281   : > { %4357 = vmatprep.mubr.msk.bf16.mxu0 %vm4814_vm0, %v6324_v1 }
 0x288   : > { %4358 = vmatmul.mubr.msk.bf16.vlgmr.msra.gmra.mxu0 %vm997_vm2, %v1356_v9  ;;  %v1663_v9 = vrot.slane %v5171_v23, 2 }
 0x289   : > { %4361 = vmatprep.mubr.msk.bf16.mxu0 %vm4814_vm0, %v6324_v1  ;;  %4402 = vmatpush3.bf16.msra.mxu0 %v4726_v13  ;;  %v1523_v13 = vshll.u32 %v5171_v23, 16  ;;  %v1529_v23 = vshrl.u32 %v4738_v20, 16 }
 0x28a   : > { %4403 = vmatprep.subr.bf16.mxu0 %v6324_v1  ;;  %v1664_v14 = vsel %vm1655_vm5, %v1661_v0, %v1663_v9  ;;  %v1970_v0 = vrot.slane %v1968_v58, 2  ;;  %v2113_v58 = vld [vmem:[%s4954_s22 + $0x8] sm:$0x8] }
 0x28b   : > { %v1531_v31 = vrot.slane %v1529_v23, 1  ;;  %v1825_v23 = vrot.slane %v5292_v12, 2 }
 0x28c   : > { %v1974_v6 = vor.u32 %v1973_v2, %v1970_v0 }
 0x28d   : > { %4404 = vmatpush3.bf16.msra.mxu0 %v4731_v25  ;;  %v1777_v25 = vld [vmem:[%s4954_s22 + $0x8] sm:$0xc] }
 0x28e   : > { %4449 = vmatprep.subr.bf16.mxu0 %v6324_v1 }
 0x290   : > { %4362 = vmatmul.mubr.msk.bf16.gmra.mxu0 %vm997_vm2, %v1358_v16  ;;  %v1525_v16 = vrot.slane %v1523_v13, 2  ;;  %v4714_v13 = vld [vmem:[%s6317_s8 + $0x28] sm:$0xff]  }
 0x291   : > { %4365 = vmatprep.mubr.msk.bf16.mxu0 %vm4814_vm0, %v6324_v1 }
 0x292   : > { %v1526_v18 = vor.u32 %v1525_v16, %v1522_v15  ;;  %v1980_v15 = vshll.u32 %v5292_v12, 16 }
 0x294   : > { %v5240_v19 = vsel %vm1483_vm6, %v1517_v7, %v1526_v18  ;;  %v1823_v7 = vrot.slane %v5265_v53, 2 }
 0x298   : > { %4366 = vmatmul.mubr.msk.bf16.gmra.mxu0 %vm997_vm2, %v1360_v21  ;;  %v1665_v21 = vrot.slane %v4738_v20, 2  ;;  %v4718_v20 = vld [vmem:[%s6317_s8 + $0x20] sm:$0xff]  }
 0x299   : > { %4369 = vmatprep.mubr.msk.bf16.mxu0 %vm4814_vm0, %v6324_v1 }
 0x29a   : > { %v1666_v30 = vsel %vm1655_vm5, %v1663_v9, %v1665_v21 }
 0x2a0   : > { %4370 = vmatmul.mubr.msk.bf16.gmra.mxu0 %vm997_vm2, %v1362_v28  ;;  %v5245_v28 = vld [vmem:[%s4954_s22 + $0xc] sm:$0xf] }
 0x2a1   : > { %4373 = vmatprep.mubr.msk.bf16.mxu0 %vm4814_vm0, %v6324_v1  ;;  %v3896_v33 = vcombine.low %v1777_v25, %v5245_v28  ;;  %v5315_v25 = vsel %vm1655_vm5, %v1823_v7, %v1825_v23  ;;  %v3917_v59 = vcombine.low %v2113_v58, %v5245_v28  ;;  %v4753_v28 = vld [vmem:[%s5014_s20 + $0x38] sm:$0xff]  }
 0x2a3   : > { %v1951_v36 = vshrl.u32 %v3896_v33, 16  ;;  %v1954_v37 = vshll.u32 %v3896_v33, 16  ;;  %v1820_v47 = vrot.slane %v3896_v33, 2  ;;  %v2122_v0 = vrot.slane %v3917_v59, 3 }
 0x2a5   : > { %v1956_v43 = vrot.slane %v1954_v37, 3  ;;  %v5262_v52 = vsel %vm1655_vm5, %v1820_v47, %v1821_v48 }
 0x2a8   : > { %4374 = vmatmul.mubr.msk.bf16.gmra.mxu0 %vm997_vm2, %v1364_v32  ;;  %v1534_v32 = vrot.slane %v1532_v24, 2 }
 0x2a9   : > { %4405 = vmatprep.mubr.msk.bf16.mxu0 %vm4814_vm0, %v6324_v1 }
 0x2aa   : > { %v1535_v35 = vor.u32 %v1534_v32, %v1531_v31 }
 0x2ac   : > { %v5258_v40 = vsel %vm1483_vm6, %v1526_v18, %v1535_v35  ;;  %v1982_v18 = vrot.slane %v1980_v15, 3  ;;  %v2131_v15 = vrot.slane %v5338_v39, 3 }
 0x2b0   : > { %4406 = vmatmul.mubr.msk.bf16.vlgmr.msra.gmra.mxu0 %vm997_vm2, %v1658_v41  ;;  %v1953_v41 = vrot.slane %v1951_v36, 2 }
 0x2b1   : > { %4409 = vmatprep.mubr.msk.bf16.mxu0 %vm4814_vm0, %v6324_v1  ;;  %4450 = vmatpush3.bf16.msra.mxu0 %v4735_v51  ;;  %v1965_v51 = vor.u32 %v1964_v45, %v1961_v44  ;;  %v5350_v45 = vld [vmem:[%s4954_s22 + $0x28] ss:$0 sps:$4 sm:$0x11]  }
 0x2b2   : > { %4451 = vmatprep.subr.bf16.mxu0 %v6324_v1  ;;  %v1957_v46 = vor.u32 %v1956_v43, %v1953_v41  ;;  %v1995_v41 = vshrl.u32 %v5338_v39, 16 }
 0x2b3   : > { %v1975_v9 = vsel %vm1949_vm7, %v1965_v51, %v1974_v6 }
 0x2b4   : > { %v1966_v54 = vsel %vm1949_vm7, %v1957_v46, %v1965_v51  ;;  %v1997_v43 = vrot.slane %v1995_v41, 2  ;;  %v981_v51 = vshll.u32 %v5350_v45, 16 }
 0x2b5   : > { %4452 = vmatpush3.bf16.msra.mxu0 %v4737_v10  ;;  %v5289_v10 = vsel %vm1655_vm5, %v1821_v48, %v1823_v7  ;;  %v977_v48 = vshrl.u32 %v5112_v57, 16 }
 0x2b6   : > { %4497 = vmatprep.subr.bf16.mxu0 %v6324_v1 }
 0x2b8   : > { %4410 = vmatmul.mubr.msk.bf16.gmra.mxu0 %vm997_vm2, %v1660_v56  ;;  %v4709_v56 = vld [vmem:[%s6317_s8 + $0x18] sm:$0xff]  }
 0x2b9   : > { %4413 = vmatprep.mubr.msk.bf16.mxu0 %vm4814_vm0, %v6324_v1 }
 0x2c0   : > { %4414 = vmatmul.mubr.msk.bf16.gmra.mxu0 %vm997_vm2, %v1662_v4  ;;  %v4711_v4 = vld [vmem:[%s6317_s8 + $0x10] sm:$0xff]  }
 0x2c1   : > { %4417 = vmatprep.mubr.msk.bf16.mxu0 %vm4814_vm0, %v6324_v1 }
 0x2c8   : > { %4418 = vmatmul.mubr.msk.bf16.gmra.mxu0 %vm997_vm2, %v1664_v14  ;;  %v1977_v14 = vshrl.u32 %v5292_v12, 16 }
 0x2c9   : > { %4421 = vmatprep.mubr.msk.bf16.mxu0 %vm4814_vm0, %v6324_v1 }
 0x2ca   : > { %v1979_v16 = vrot.slane %v1977_v14, 2 }
 0x2cc   : > { %v1983_v21 = vor.u32 %v1982_v18, %v1979_v16  ;;  %v4758_v16 = vld [vmem:[%s5014_s20 + $0x8] sm:$0xff]  }
 0x2ce   : > { %v1984_v24 = vsel %vm1949_vm7, %v1974_v6, %v1983_v21  ;;  %v2127_v6 = vrot.slane %v5292_v12, 3 }
 0x2d0   : > { %4422 = vmatmul.mubr.msk.bf16.gmra.mxu0 %vm997_vm2, %v1666_v30 }
 0x2d1   : > { %4453 = vmatprep.mubr.msk.bf16.mxu0 %vm4814_vm0, %v6324_v1 }
 0x2d8   : > { %4454 = vmatmul.mubr.msk.bf16.vlgmr.msra.gmra.mxu0 %vm997_vm2, %v1966_v54  ;;  %v983_v54 = vrot.slane %v981_v51, 1  ;;  %v4734_v51 = vld [vmem:[%s6317_s8 + $0x68] sm:$0xff]  }
 0x2d9   : > { %4457 = vmatprep.mubr.msk.bf16.mxu0 %vm4814_vm0, %v6324_v1  ;;  %4498 = vmatpush3.bf16.msra.mxu0 %v4742_v5  ;;  %v4754_v5 = vld [vmem:[%s5014_s20 + $0x40] sm:$0xff]  }
 0x2da   : > { %4541 = vmatprep.subr.bf16.mxu0 %v6324_v1 }
 0x2e0   : > { %4458 = vmatmul.mubr.msk.bf16.gmra.mxu0 %vm997_vm2, %v1975_v9 }
 0x2e1   : > { %4461 = vmatprep.mubr.msk.bf16.mxu0 %vm4814_vm0, %v6324_v1 }
 0x2e8   : > { %4462 = vmatmul.mubr.msk.bf16.gmra.mxu0 %vm997_vm2, %v1984_v24  ;;  %v2602_v24 = vshll.u32 %v4758_v16, 16 }
 0x2e9   : > { %4465 = vmatprep.mubr.msk.bf16.mxu0 %vm4814_vm0, %v6324_v1 }
 0x318   : > { %v809_v60 = vpop.f32.mrf.mxu0 }
 0x319   : > { %4279 = vmatmul.mubr.msk.f32.vlgmr.msra.gmra.mxu1 %vm506_vm1, %v809_v60  ;;  %v2123_v60 = vrot.slane %v5250_v34, 3  ;;  %v2125_v34 = vrot.slane %v5265_v53, 3  ;;  %v4730_v53 = vld [vmem:[%s6317_s8 + $0x40] sm:$0xff]  }
 0x31a   : > { %4282 = vmatpush3.bf16.msra.mxu1 %v4709_v56  ;;  %v4273_v3 = vpop.f32.mrf.mxu0  ;;  %4285 = vmatprep.mubr.msk.bf16.mxu1 %vm4814_vm0, %v6324_v1  ;;  %v4749_v56 = vld [vmem:[%s5014_s20 + $0x30] sm:$0xff]  }
 0x31b   : > { %4283 = vmatprep.subr.bf16.mxu1 %v6324_v1  ;;  %v5383_v3 = vsel %vm2121_vm8, %v2123_v60, %v2125_v34  ;;  %v5403_v7 = vsel %vm2121_vm8, %v2125_v34, %v2127_v6 }
 0x31e   : > { %4284 = vmatpush3.bf16.msra.mxu1 %v4711_v4  ;;  %v4725_v4 = vld [vmem:[%s6317_s8 + $0x48] sm:$0xff]  }
 0x31f   : > { %4329 = vmatprep.subr.bf16.mxu1 %v6324_v1 }
 0x320   : > { %v5427_v14 = vpop.f32.mrf.mxu0 }
 0x321   : > { %4286 = vmatmul.mubr.msk.bf16.vlgmr.msra.gmra.mxu1 %vm997_vm2, %v5086_v42  ;;  %v5318_v42 = vld [vmem:[%s4954_s22 + $0x28] sm:$0xff]  }
 0x322   : > { %4330 = vmatpush3.bf16.msra.mxu1 %v4714_v13  ;;  %4289 = vmatprep.mubr.msk.bf16.mxu1 %vm4814_vm0, %v6324_v1  ;;  %v1986_v30 = vshrl.u32 %v5318_v42, 16  ;;  %v1989_v31 = vshll.u32 %v5318_v42, 16  ;;  %v1827_v36 = vrot.slane %v5318_v42, 2  ;;  %v2129_v9 = vrot.slane %v5318_v42, 3  ;;  %v4757_v13 = vld [vmem:[%s5014_s20] sm:$0xff]  }
 0x323   : > { %4331 = vmatprep.subr.bf16.mxu1 %v6324_v1  ;;  %v2597_v18 = vshll.u32 %v4757_v13, 16 }
 0x324   : > { %v1988_v32 = vrot.slane %v1986_v30, 2  ;;  %v1991_v33 = vrot.slane %v1989_v31, 3  ;;  %v5335_v38 = vsel %vm1655_vm5, %v1825_v23, %v1827_v36  ;;  %v5416_v12 = vsel %vm2121_vm8, %v2127_v6, %v2129_v9 }
 0x325   : > { %v2599_v23 = vrot.slane %v2597_v18, 1  ;;  %v1199_v31 = vrot.slane %v5350_v45, 1  ;;  %v4768_v18 = vld [vmem:[%s5014_s20 + $0x28] ss:$0 sps:$4 sm:$0x11]  }
 0x326   : > { %4332 = vmatpush3.bf16.msra.mxu1 %v4718_v20  ;;  %v1992_v35 = vor.u32 %v1991_v33, %v1988_v32  ;;  %v4311_v20 = vpop.f32.mrf.mxu0  ;;  %v2604_v33 = vrot.slane %v2602_v24, 1 }
 0x327   : > { %4377 = vmatprep.subr.bf16.mxu1 %v6324_v1  ;;  %v1200_v41 = vsel %vm1189_vm4, %v1197_v26, %v1199_v31 }
 0x328   : > { %v1993_v37 = vsel %vm1949_vm7, %v1983_v21, %v1992_v35  ;;  %v2595_v21 = vshrl.u32 %v4757_v13, 16  ;;  %v5439_v30 = vpop.f32.mrf.mxu0 }
 0x329   : > { %4290 = vmatmul.mubr.msk.bf16.gmra.mxu1 %vm997_vm2, %v5099_v49  ;;  %4466 = vmatmul.mubr.msk.bf16.gmra.mxu0 %vm997_vm2, %v1993_v37  ;;  %v1998_v49 = vshll.u32 %v5338_v39, 16 }
 0x32a   : > { %4293 = vmatprep.mubr.msk.bf16.mxu1 %vm4814_vm0, %v6324_v1  ;;  %4469 = vmatprep.mubr.msk.bf16.mxu0 %vm4814_vm0, %v6324_v1  ;;  %v2600_v32 = vor.u32 %v2599_v23, %v2595_v21  ;;  %v2634_v21 = vshll.u32 %v4768_v18, 16 }
 0x32b   : > { %v2000_v44 = vrot.slane %v1998_v49, 3 }
 0x32c   : > { %v2605_v37 = vsel %vm940_vm3, %v2600_v32, %v2604_v33  ;;  %v2636_v31 = vrot.slane %v2634_v21, 1 }
 0x32d   : > { %v2001_v46 = vor.u32 %v2000_v44, %v1997_v43  ;;  %v2606_v43 = vshrl.u32 %v4758_v16, 16 }
 0x32f   : > { %v2002_v47 = vsel %vm1949_vm7, %v1992_v35, %v2001_v46  ;;  %v4312_v35 = vpop.f32.mrf.mxu0  ;;  %v2608_v57 = vor.u32 %v2606_v43, %v2604_v33 }
 0x331   : > { %4294 = vmatmul.mubr.msk.bf16.gmra.mxu1 %vm997_vm2, %v5106_v55  ;;  %4470 = vmatmul.mubr.msk.bf16.gmra.mxu0 %vm997_vm2, %v2002_v47  ;;  %v979_v55 = vor.u32 %v977_v48, %v5117_v61  ;;  %v4752_v61 = vld [vmem:[%s6320_s11 + $0x10] sm:$0xff]   ;;  %v5445_v39 = vpop.f32.mrf.mxu0 }
 0x332   : > { %4297 = vmatprep.mubr.msk.bf16.mxu1 %vm4814_vm0, %v6324_v1  ;;  %4499 = vmatprep.mubr.msk.bf16.mxu0 %vm4814_vm0, %v6324_v1 }
 0x333   : > { %v984_v2 = vsel %vm940_vm3, %v979_v55, %v983_v54  ;;  %v4315_v49 = vpop.f32.mrf.mxu0  ;;  %v4764_v55 = vld [vmem:[%s5014_s20 + $0x18] sm:$0xff]  }
 0x334   : > { %v2618_v58 = vshll.u32 %v4764_v55, 16 }
 0x335   : > { %v5455_v45 = vpop.f32.mrf.mxu0 }
 0x337   : > { %v4316_v26 = vpop.f32.mrf.mxu0 }
 0x339   : > { %4298 = vmatmul.mubr.msk.bf16.gmra.mxu1 %vm997_vm2, %v5123_v62  ;;  %4500 = vmatmul.mubr.msk.bf16.vlgmr.msra.gmra.mxu0 %vm506_vm1, %v4749_v56  ;;  %v5370_v62 = vsel %vm2121_vm8, %v2122_v0, %v2123_v60  ;;  %v5460_v48 = vpop.f32.mrf.mxu0  ;;  %v4736_v60 = vld [vmem:[%s6317_s8 + $0x60] sm:$0xff]  }
 0x33a   : > { %4301 = vmatprep.mubr.msk.bf16.mxu1 %vm4814_vm0, %v6324_v1  ;;  %4503 = vmatprep.mubr.msk.bf16.mxu0 %vm4814_vm0, %v6324_v1  ;;  %v4761_v0 = vld [vmem:[%s6320_s11 + $0x20] sm:$0xff]  }
 0x33b   : > { %4542 = vmatpush3.bf16.msra.mxu0 %v4752_v61  ;;  %v4319_v54 = vpop.f32.mrf.mxu0  ;;  %v2620_v61 = vrot.slane %v2618_v58, 1 }
 0x33c   : > { %4585 = vmatprep.subr.bf16.mxu0 %v6324_v1 }
 0x33d   : > { %v5471_v59 = vpop.f32.mrf.mxu0 }
 0x341   : > { %4302 = vmatmul.mubr.msk.bf16.gmra.mxu1 %vm997_vm2, %v984_v2  ;;  %4504 = vmatmul.mubr.msk.bf16.gmra.mxu0 %vm506_vm1, %v4753_v28 }
 0x342   : > { %4333 = vmatprep.mubr.msk.bf16.mxu1 %vm4814_vm0, %v6324_v1  ;;  %4507 = vmatprep.mubr.msk.bf16.mxu0 %vm4814_vm0, %v6324_v1 }
 0x349   : > { %4334 = vmatmul.mubr.msk.bf16.vlgmr.msra.gmra.mxu1 %vm997_vm2, %v5142_v11  ;;  %4508 = vmatmul.mubr.msk.bf16.gmra.mxu0 %vm506_vm1, %v4754_v5  ;;  %v4755_v11 = vld [vmem:[%s5014_s20 + $0x48] sm:$0xff]   ;;  %v2622_v5 = vshrl.u32 %v4764_v55, 16  ;;  %v4746_v55 = vld [vmem:[%s6317_s8 + $0x80] sm:$0xff]  }
 0x34a   : > { %4378 = vmatpush3.bf16.msra.mxu1 %v4725_v4  ;;  %4337 = vmatprep.mubr.msk.bf16.mxu1 %vm4814_vm0, %v6324_v1  ;;  %v4766_v4 = vld [vmem:[%s5014_s20 + $0x20] sm:$0xff]  }
 0x34b   : > { %4379 = vmatprep.subr.bf16.mxu1 %v6324_v1  ;;  %4511 = vmatprep.mubr.msk.bf16.mxu0 %vm4814_vm0, %v6324_v1  ;;  %v2626_v6 = vshll.u32 %v4766_v4, 16 }
 0x34e   : > { %4380 = vmatpush3.bf16.msra.mxu1 %v4730_v53 }
 0x34f   : > { %4425 = vmatprep.subr.bf16.mxu1 %v6324_v1 }
 0x351   : > { %4338 = vmatmul.mubr.msk.bf16.gmra.mxu1 %vm997_vm2, %v5153_v17  ;;  %4512 = vmatmul.mubr.msk.bf16.gmra.mxu0 %vm506_vm1, %v4755_v11  ;;  %v4756_v17 = vld [vmem:[%s5014_s20 + $0x50] sm:$0xff]  }
 0x352   : > { %4341 = vmatprep.mubr.msk.bf16.mxu1 %vm4814_vm0, %v6324_v1  ;;  %4515 = vmatprep.mubr.msk.bf16.mxu0 %vm4814_vm0, %v6324_v1 }
 0x359   : > { %4342 = vmatmul.mubr.msk.bf16.gmra.mxu1 %vm997_vm2, %v5165_v22  ;;  %4516 = vmatmul.mubr.msk.bf16.gmra.mxu0 %vm506_vm1, %v4756_v17  ;;  %v5435_v22 = vsel %vm2121_vm8, %v2129_v9, %v2131_v15  ;;  %v2624_v9 = vor.u32 %v2622_v5, %v2620_v61  ;;  %v2628_v17 = vrot.slane %v2626_v6, 1  ;;  %v4748_v5 = vld [vmem:[%s4954_s22 + $0x30] ss:$0 sps:$4 sm:$0x33]  }
 0x35a   : > { %4345 = vmatprep.mubr.msk.bf16.mxu1 %vm4814_vm0, %v6324_v1  ;;  %4543 = vmatprep.mubr.msk.bf16.mxu0 %vm4814_vm0, %v6324_v1 }
 0x35b   : > { %v2629_v15 = vsel %vm940_vm3, %v2624_v9, %v2628_v17  ;;  %v5590_v9 = vld [vmem:[%s5014_s20 + $0x4] sm:$0xfe]  }
 0x361   : > { %4346 = vmatmul.mubr.msk.bf16.gmra.mxu1 %vm997_vm2, %v5182_v29  ;;  %4544 = vmatmul.mubr.msk.bf16.vlgmr.msra.gmra.mxu0 %vm506_vm1, %v2605_v37  ;;  %v4762_v29 = vld [vmem:[%s5014_s20 + $0x10] sm:$0xff]  }
 0x362   : > { %4349 = vmatprep.mubr.msk.bf16.mxu1 %vm4814_vm0, %v6324_v1  ;;  %4547 = vmatprep.mubr.msk.bf16.mxu0 %vm4814_vm0, %v6324_v1  ;;  %v2610_v44 = vshll.u32 %v4762_v29, 16  ;;  %v2614_v56 = vshrl.u32 %v4762_v29, 16  ;;  %v4770_v29 = vld [vmem:[%s5014_s20 + $0x90] sm:$0xff]  }
 0x363   : > { %4586 = vmatpush3.bf16.msra.mxu0 %v4761_v0 }
 0x364   : > { %v2612_v46 = vrot.slane %v2610_v44, 1  ;;  %4629 = vmatprep.subr.bf16.mxu0 %v6324_v1 }
 0x366   : > { %v2613_v47 = vsel %vm940_vm3, %v2608_v57, %v2612_v46  ;;  %v2616_v2 = vor.u32 %v2614_v56, %v2612_v46  ;;  %v4773_v57 = vld [vmem:[%s6320_s11 + $0x30] sm:$0xff]   ;;  %v4774_v46 = vld [vmem:[%s5014_s20 + $0x98] sm:$0xff]   ;;  %v4776_v56 = vld [vmem:[%s5014_s20 + $0xa0] sm:$0xff]  }
 0x368   : > { %v2621_v28 = vsel %vm940_vm3, %v2616_v2, %v2620_v61  ;;  %v4778_v2 = vld [vmem:[%s5014_s20 + $0xa8] sm:$0xff]  }
 0x369   : > { %4350 = vmatmul.mubr.msk.bf16.gmra.mxu1 %vm997_vm2, %v1200_v41  ;;  %4548 = vmatmul.mubr.msk.bf16.gmra.mxu0 %vm506_vm1, %v2613_v47  ;;  %v4741_v47 = vld [vmem:[%s6317_s8 + $0x88] sm:$0xff]  }
 0x36a   : > { %4381 = vmatprep.mubr.msk.bf16.mxu1 %vm4814_vm0, %v6324_v1  ;;  %4551 = vmatprep.mubr.msk.bf16.mxu0 %vm4814_vm0, %v6324_v1 }
 0x371   : > { %4382 = vmatmul.mubr.msk.bf16.vlgmr.msra.gmra.mxu1 %vm997_vm2, %v5202_v50  ;;  %v4320_v50 = vpop.f32.mrf.mxu0  ;;  %4552 = vmatmul.mubr.msk.bf16.gmra.mxu0 %vm506_vm1, %v2621_v28 }
 0x372   : > { %4426 = vmatpush3.bf16.msra.mxu1 %v4734_v51  ;;  %4385 = vmatprep.mubr.msk.bf16.mxu1 %vm4814_vm0, %v6324_v1 }
 0x373   : > { %4427 = vmatprep.subr.bf16.mxu1 %v6324_v1  ;;  %v5483_v34 = vpop.f32.mrf.mxu0  ;;  %4555 = vmatprep.mubr.msk.bf16.mxu0 %vm4814_vm0, %v6324_v1 }
 0x375   : > { %v4323_v53 = vpop.f32.mrf.mxu0 }
 0x376   : > { %4428 = vmatpush3.bf16.msra.mxu1 %v4736_v60 }
 0x377   : > { %4473 = vmatprep.subr.bf16.mxu1 %v6324_v1  ;;  %v5493_v11 = vpop.f32.mrf.mxu0 }
 0x379   : > { %4386 = vmatmul.mubr.msk.bf16.gmra.mxu1 %vm997_vm2, %v5216_v63  ;;  %v4324_v13 = vpop.f32.mrf.mxu0  ;;  %4556 = vmatmul.mubr.msk.bf16.gmra.mxu0 %vm506_vm1, %v2629_v15  ;;  %v2630_v63 = vshrl.u32 %v4766_v4, 16  ;;  %v4780_v4 = vld [vmem:[%s5014_s20 + $0xb0] sm:$0xff]   ;;  %v3254_v15 = vrot.slane %v5590_v9, 1 }
 0x37a   : > { %4389 = vmatprep.mubr.msk.bf16.mxu1 %vm4814_vm0, %v6324_v1  ;;  %4559 = vmatprep.mubr.msk.bf16.mxu0 %vm4814_vm0, %v6324_v1  ;;  %v1829_v13 = vrot.slane %v4748_v5, 2 }
 0x37b   : > { %v5498_v16 = vpop.f32.mrf.mxu0  ;;  %v2632_v24 = vor.u32 %v2630_v63, %v2628_v17 }
 0x37d   : > { %v4327_v20 = vpop.f32.mrf.mxu0  ;;  %v2637_v33 = vsel %vm940_vm3, %v2632_v24, %v2636_v31  ;;  %v1830_v24 = vsel %vm1655_vm5, %v1827_v36, %v1829_v13  ;;  %v5613_v31 = vld [vmem:[%s5014_s20 + $0x14] sm:$0xff]   ;;  %v4787_v36 = vld [vmem:[%s6320_s11 + $0x40] sm:$0xff]  }
 0x37e   : > { %v3257_v42 = vrot.slane %v5613_v31, 1 }
 0x37f   : > { %v5506_v23 = vpop.f32.mrf.mxu0 }
 0x381   : > { %4390 = vmatmul.mubr.msk.bf16.gmra.mxu1 %vm997_vm2, %v5226_v8  ;;  %v4328_v32 = vpop.f32.mrf.mxu0  ;;  %4560 = vmatmul.mubr.msk.bf16.gmra.mxu0 %vm506_vm1, %v2637_v33 }
 0x382   : > { %4393 = vmatprep.mubr.msk.bf16.mxu1 %vm4814_vm0, %v6324_v1  ;;  %4587 = vmatprep.mubr.msk.bf16.mxu0 %vm4814_vm0, %v6324_v1 }
 0x383   : > { %v5511_v35 = vpop.f32.mrf.mxu0 }
 0x385   : > { %v4359_v37 = vpop.f32.mrf.mxu0 }
 0x387   : > { %v5518_v8 = vpop.f32.mrf.mxu0 }
 0x389   : > { %4394 = vmatmul.mubr.msk.bf16.gmra.mxu1 %vm997_vm2, %v5240_v19  ;;  %v4360_v41 = vpop.f32.mrf.mxu0  ;;  %4588 = vmatmul.mubr.msk.bf16.vlgmr.msra.gmra.mxu0 %vm506_vm1, %v4770_v29  ;;  %v4751_v29 = vld [vmem:[%s6320_s11] sm:$0xff]  }
 0x38a   : > { %4397 = vmatprep.mubr.msk.bf16.mxu1 %vm4814_vm0, %v6324_v1  ;;  %4591 = vmatprep.mubr.msk.bf16.mxu0 %vm4814_vm0, %v6324_v1 }
 0x38b   : > { %v5523_v49 = vpop.f32.mrf.mxu0  ;;  %4630 = vmatpush3.bf16.msra.mxu0 %v4773_v57 }
 0x38c   : > { %4673 = vmatprep.subr.bf16.mxu0 %v6324_v1 }
 0x38d   : > { %v4363_v43 = vpop.f32.mrf.mxu0 }
 0x38f   : > { %v5530_v44 = vpop.f32.mrf.mxu0 }
 0x391   : > { %4398 = vmatmul.mubr.msk.bf16.gmra.mxu1 %vm997_vm2, %v5258_v40  ;;  %v4364_v19 = vpop.f32.mrf.mxu0  ;;  %4592 = vmatmul.mubr.msk.bf16.gmra.mxu0 %vm506_vm1, %v4774_v46 }
 0x392   : > { %4429 = vmatprep.mubr.msk.bf16.mxu1 %vm4814_vm0, %v6324_v1  ;;  %4595 = vmatprep.mubr.msk.bf16.mxu0 %vm4814_vm0, %v6324_v1  ;;  %v5634_v19 = vld [vmem:[%s5014_s20 + $0x1c] sm:$0xff]  }
 0x393   : > { %v5538_v26 = vpop.f32.mrf.mxu0  ;;  %v3259_v46 = vrot.slane %v5634_v19, 1 }
 0x395   : > { %v4367_v40 = vpop.f32.mrf.mxu0 }
 0x396   : > { %v3260_v40 = vsel %vm1189_vm4, %v3257_v42, %v3259_v46 }
 0x397   : > { %v5549_v51 = vpop.f32.mrf.mxu0 }
 0x399   : > { %4430 = vmatmul.mubr.msk.bf16.vlgmr.msra.gmra.mxu1 %vm997_vm2, %v5262_v52  ;;  %v4368_v54 = vpop.f32.mrf.mxu0  ;;  %4596 = vmatmul.mubr.msk.bf16.gmra.mxu0 %vm506_vm1, %v4776_v56 }
 0x39a   : > { %4474 = vmatpush3.bf16.msra.mxu1 %v4741_v47  ;;  %4433 = vmatprep.mubr.msk.bf16.mxu1 %vm4814_vm0, %v6324_v1 }
 0x39b   : > { %4475 = vmatprep.subr.bf16.mxu1 %v6324_v1  ;;  %v5558_v58 = vpop.f32.mrf.mxu0  ;;  %4599 = vmatprep.mubr.msk.bf16.mxu0 %vm4814_vm0, %v6324_v1 }
 0x39d   : > { %v4371_v52 = vpop.f32.mrf.mxu0 }
 0x39e   : > { %4476 = vmatpush3.bf16.msra.mxu1 %v4746_v55 }
 0x39f   : > { %4519 = vmatprep.subr.bf16.mxu1 %v6324_v1  ;;  %v5566_v60 = vpop.f32.mrf.mxu0 }
 0x3a1   : > { %4434 = vmatmul.mubr.msk.bf16.gmra.mxu1 %vm997_vm2, %v5289_v10  ;;  %v4372_v0 = vpop.f32.mrf.mxu0  ;;  %4600 = vmatmul.mubr.msk.bf16.gmra.mxu0 %vm506_vm1, %v4778_v2 }
 0x3a2   : > { %4437 = vmatprep.mubr.msk.bf16.mxu1 %vm4814_vm0, %v6324_v1  ;;  %4603 = vmatprep.mubr.msk.bf16.mxu0 %vm4814_vm0, %v6324_v1 }
 0x3a3   : > { %v5571_v61 = vpop.f32.mrf.mxu0 }
 0x3a5   : > { %v4375_v50 = vpop.f32.mrf.mxu0 }
 0x3a7   : > { %v5578_v10 = vpop.f32.mrf.mxu0 }
 0x3a9   : > { %4438 = vmatmul.mubr.msk.bf16.gmra.mxu1 %vm997_vm2, %v5315_v25  ;;  %v4376_v28 = vpop.f32.mrf.mxu0  ;;  %4604 = vmatmul.mubr.msk.bf16.gmra.mxu0 %vm506_vm1, %v4780_v4  ;;  %v5593_v25 = vld [vmem:[%s5014_s20 + $0xc] sm:$0xff]  }
 0x3aa   : > { %4441 = vmatprep.mubr.msk.bf16.mxu1 %vm4814_vm0, %v6324_v1  ;;  %4631 = vmatprep.mubr.msk.bf16.mxu0 %vm4814_vm0, %v6324_v1  ;;  %v3255_v18 = vrot.slane %v5593_v25, 1  ;;  %v4794_v4 = vld [vmem:[%s5014_s20 + $0x2c] ss:$0 sps:$4 sm:$0x11]  }
 0x3ab   : > { %v5583_v53 = vpop.f32.mrf.mxu0  ;;  %v3263_v5 = vrot.slane %v4794_v4, 1 }
 0x3ac   : > { %v3256_v63 = vsel %vm1189_vm4, %v3254_v15, %v3255_v18  ;;  %v3258_v37 = vsel %vm1189_vm4, %v3255_v18, %v3257_v42  ;;  %v3532_v18 = vshrl.u32 %v5590_v9, 16 }
 0x3ad   : > { %v4407_v6 = vpop.f32.mrf.mxu0 }
 0x3af   : > { %v5597_v17 = vpop.f32.mrf.mxu0 }
 0x3b1   : > { %4442 = vmatmul.mubr.msk.bf16.gmra.mxu1 %vm997_vm2, %v5335_v38  ;;  %v4408_v20 = vpop.f32.mrf.mxu0  ;;  %4632 = vmatmul.mubr.msk.bf16.vlgmr.msra.gmra.mxu0 %vm506_vm1, %v3256_v63  ;;  %v3543_v63 = vshll.u32 %v5593_v25, 16 }
 0x3b2   : > { %4445 = vmatprep.mubr.msk.bf16.mxu1 %vm4814_vm0, %v6324_v1  ;;  %4635 = vmatprep.mubr.msk.bf16.mxu0 %vm4814_vm0, %v6324_v1  ;;  %v3535_v20 = vshll.u32 %v5590_v9, 16 }
 0x3b3   : > { %v5604_v21 = vpop.f32.mrf.mxu0  ;;  %4674 = vmatpush3.bf16.msra.mxu0 %v4787_v36 }
 0x3b4   : > { %v3537_v42 = vrot.slane %v3535_v20, 2  ;;  %v4759_v20 = vld [vmem:[%s5014_s20] sm:$0xff]  }
 0x3b5   : > { %v4411_v38 = vpop.f32.mrf.mxu0 }
 0x3b6   : > { %v3534_v38 = vrot.slane %v3532_v18, 1 }
 0x3b7   : > { %v5616_v32 = vpop.f32.mrf.mxu0 }
 0x3b9   : > { %4446 = vmatmul.mubr.msk.bf16.gmra.mxu1 %vm997_vm2, %v1830_v24  ;;  %v4412_v33 = vpop.f32.mrf.mxu0  ;;  %4636 = vmatmul.mubr.msk.bf16.gmra.mxu0 %vm506_vm1, %v3258_v37  ;;  %v3545_v37 = vrot.slane %v3543_v63, 2 }
 0x3ba   : > { %4477 = vmatprep.mubr.msk.bf16.mxu1 %vm4814_vm0, %v6324_v1  ;;  %4639 = vmatprep.mubr.msk.bf16.mxu0 %vm4814_vm0, %v6324_v1 }
 0x3bb   : > { %v5625_v41 = vpop.f32.mrf.mxu0 }
 0x3bd   : > { %v4415_v43 = vpop.f32.mrf.mxu0 }
 0x3bf   : > { %v5638_v57 = vpop.f32.mrf.mxu0 }
 0x3c1   : > { %4478 = vmatmul.mubr.msk.bf16.vlgmr.msra.gmra.mxu1 %vm997_vm2, %v5370_v62  ;;  %v4416_v47 = vpop.f32.mrf.mxu0  ;;  %4640 = vmatmul.mubr.msk.bf16.gmra.mxu0 %vm506_vm1, %v3260_v40  ;;  %v5651_v62 = vld [vmem:[%s5014_s20 + $0x24] sm:$0xff]  }
 0x3c2   : > { %4520 = vmatpush3.bf16.msra.mxu1 %v4751_v29  ;;  %4481 = vmatprep.mubr.msk.bf16.mxu1 %vm4814_vm0, %v6324_v1  ;;  %v3261_v52 = vrot.slane %v5651_v62, 1  ;;  %v3538_v29 = vor.u32 %v3537_v42, %v3534_v38 }
 0x3c3   : > { %4563 = vmatprep.subr.bf16.mxu1 %v6324_v1  ;;  %v5645_v55 = vpop.f32.mrf.mxu0  ;;  %4643 = vmatprep.mubr.msk.bf16.mxu0 %vm4814_vm0, %v6324_v1 }
 0x3c4   : > { %v3262_v2 = vsel %vm1189_vm4, %v3259_v46, %v3261_v52  ;;  %v3264_v13 = vsel %vm1189_vm4, %v3261_v52, %v3263_v5 }
 0x3c5   : > { %v4419_v54 = vpop.f32.mrf.mxu0 }
 0x3c6   : > { %v3552_v54 = vshll.u32 %v5613_v31, 16 }
 0x3c7   : > { %v5655_v56 = vpop.f32.mrf.mxu0 }
 0x3c9   : > { %4482 = vmatmul.mubr.msk.bf16.gmra.mxu1 %vm997_vm2, %v5383_v3  ;;  %v4420_v0 = vpop.f32.mrf.mxu0  ;;  %4644 = vmatmul.mubr.msk.bf16.gmra.mxu0 %vm506_vm1, %v3262_v2  ;;  %v3554_v2 = vrot.slane %v3552_v54, 2  ;;  %v4763_v54 = vld [vmem:[%s5014_s20 + $0x8] sm:$0xff]  }
 0x3ca   : > { %4485 = vmatprep.mubr.msk.bf16.mxu1 %vm4814_vm0, %v6324_v1  ;;  %4647 = vmatprep.mubr.msk.bf16.mxu0 %vm4814_vm0, %v6324_v1 }
 0x3cb   : > { %v5661_v50 = vpop.f32.mrf.mxu0 }
 0x3cd   : > { %v4423_v28 = vpop.f32.mrf.mxu0 }
 0x3cf   : > { %v5669_v3 = vpop.f32.mrf.mxu0 }
 0x3d1   : > { %4486 = vmatmul.mubr.msk.bf16.gmra.mxu1 %vm997_vm2, %v5403_v7  ;;  %v4424_v6 = vpop.f32.mrf.mxu0  ;;  %4648 = vmatmul.mubr.msk.bf16.gmra.mxu0 %vm506_vm1, %v3264_v13  ;;  %v3540_v7 = vshrl.u32 %v5593_v25, 16 }
 0x3d2   : > { %4489 = vmatprep.mubr.msk.bf16.mxu1 %vm4814_vm0, %v6324_v1  ;;  %4675 = vmatprep.mubr.msk.bf16.mxu0 %vm4814_vm0, %v6324_v1 }
 0x3d3   : > { %v5674_v15 = vpop.f32.mrf.mxu0  ;;  %v3542_v36 = vrot.slane %v3540_v7, 1  ;;  %v4760_v7 = vld [vmem:[%s6320_s11 + $0x18] sm:$0xff]  }
 0x3d5   : > { %v4455_v24 = vpop.f32.mrf.mxu0  ;;  %v3546_v46 = vor.u32 %v3545_v37, %v3542_v36 }
 0x3d6   : > { %v3561_v24 = vshll.u32 %v5634_v19, 16 }
 0x3d7   : > { %v5689_v9 = vpop.f32.mrf.mxu0  ;;  %v3547_v25 = vsel %vm1483_vm6, %v3538_v29, %v3546_v46 }
 0x3d8   : > { %v3563_v37 = vrot.slane %v3561_v24, 2 }
 0x3d9   : > { %4490 = vmatmul.mubr.msk.bf16.gmra.mxu1 %vm997_vm2, %v5416_v12  ;;  %v5685_v33 = vpop.f32.mrf.mxu1  ;;  %v4456_v47 = vpop.f32.mrf.mxu0  ;;  %4676 = vmatmul.mubr.msk.bf16.vlgmr.msra.gmra.mxu0 %vm506_vm1, %v3547_v25  ;;  %v3549_v12 = vshrl.u32 %v5613_v31, 16 }
 0x3da   : > { %4493 = vmatprep.mubr.msk.bf16.mxu1 %vm4814_vm0, %v6324_v1  ;;  %4679 = vmatprep.mubr.msk.bf16.mxu0 %vm4814_vm0, %v6324_v1 }
 0x3db   : > { %v4280_v43 = vpop.f32.mrf.mxu1  ;;  %v5692_v40 = vpop.f32.mrf.mxu0  ;;  %v3551_v0 = vrot.slane %v3549_v12, 1 }
 0x3dd   : > { %v4459_v52 = vpop.f32.mrf.mxu0  ;;  %v3555_v5 = vor.u32 %v3554_v2, %v3551_v0  ;;  %v3567_v0 = vshrl.u32 %v5651_v62, 16 }
 0x3df   : > { %v5705_v4 = vpop.f32.mrf.mxu0  ;;  %v3556_v31 = vsel %vm1483_vm6, %v3546_v46, %v3555_v5 }
 0x3e1   : > { %v5699_v28 = vpop.f32.mrf.mxu1  ;;  %4494 = vmatmul.mubr.msk.bf16.gmra.mxu1 %vm997_vm2, %v5435_v22  ;;  %v4460_v13 = vpop.f32.mrf.mxu0  ;;  %4680 = vmatmul.mubr.msk.bf16.gmra.mxu0 %vm506_vm1, %v3556_v31  ;;  %v3558_v22 = vshrl.u32 %v5634_v19, 16  ;;  %v3569_v31 = vrot.slane %v3567_v0, 1 }
 0x3e2   : > { %4521 = vmatprep.mubr.msk.bf16.mxu1 %vm4814_vm0, %v6324_v1  ;;  %4683 = vmatprep.mubr.msk.bf16.mxu0 %vm4814_vm0, %v6324_v1 }
 0x3e3   : > { %v4287_v6 = vpop.f32.mrf.mxu1  ;;  %v5714_v63 = vpop.f32.mrf.mxu0  ;;  %v3560_v36 = vrot.slane %v3558_v22, 1 }
 0x3e4   : > { %v3570_v6 = vshll.u32 %v5651_v62, 16 }
 0x3e5   : > { %v5708_v18 = vpop.f32.mrf.mxu1  ;;  %v4463_v42 = vpop.f32.mrf.mxu0  ;;  %v3564_v46 = vor.u32 %v3563_v37, %v3560_v36  ;;  %v4765_v37 = vld [vmem:[%s5014_s20 + $0x10] sm:$0xff]  }
 0x3e6   : > { %v4801_v42 = vld [vmem:[%s5014_s20 + $0x2c] ss:$0 sps:$4 sm:$0x33]  }
 0x3e7   : > { %v4288_v38 = vpop.f32.mrf.mxu1  ;;  %v5726_v43 = vpop.f32.mrf.mxu0  ;;  %v3565_v25 = vsel %vm1483_vm6, %v3555_v5, %v3564_v46 }
 0x3e9   : > { %v5721_v29 = vpop.f32.mrf.mxu1  ;;  %4522 = vmatmul.mubr.msk.bf16.vlgmr.msra.gmra.mxu1 %vm506_vm1, %v4759_v20  ;;  %v4464_v47 = vpop.f32.mrf.mxu0  ;;  %4684 = vmatmul.mubr.msk.bf16.gmra.mxu0 %vm506_vm1, %v3565_v25  ;;  %v3572_v20 = vrot.slane %v3570_v6, 2  ;;  %v3579_v25 = vshll.u32 %v4801_v42, 16 }
 0x3ea   : > { %4564 = vmatpush3.bf16.msra.mxu1 %v4760_v7  ;;  %4525 = vmatprep.mubr.msk.bf16.mxu1 %vm4814_vm0, %v6324_v1  ;;  %v3576_v47 = vshrl.u32 %v4801_v42, 16 }
 0x3eb   : > { %v4291_v19 = vpop.f32.mrf.mxu1  ;;  %4607 = vmatprep.subr.bf16.mxu1 %v6324_v1  ;;  %v5733_v52 = vpop.f32.mrf.mxu0  ;;  %4687 = vmatprep.mubr.msk.bf16.mxu0 %vm4814_vm0, %v6324_v1  ;;  %v3573_v24 = vor.u32 %v3572_v20, %v3569_v31  ;;  %v3581_v6 = vrot.slane %v3579_v25, 2 }
 0x3ed   : > { %v5730_v12 = vpop.f32.mrf.mxu1  ;;  %v4467_v13 = vpop.f32.mrf.mxu0  ;;  %v3574_v62 = vsel %vm1483_vm6, %v3564_v46, %v3573_v24 }
 0x3ef   : > { %v4292_v2 = vpop.f32.mrf.mxu1  ;;  %v5745_v7 = vpop.f32.mrf.mxu0 }
 0x3f0   : > { %v3578_v2 = vrot.slane %v3576_v47, 1 }
 0x3f1   : > { %v5740_v5 = vpop.f32.mrf.mxu1  ;;  %4526 = vmatmul.mubr.msk.bf16.gmra.mxu1 %vm506_vm1, %v4763_v54  ;;  %v4468_v38 = vpop.f32.mrf.mxu0  ;;  %4688 = vmatmul.mubr.msk.bf16.gmra.mxu0 %vm506_vm1, %v3574_v62  ;;  %v4767_v62 = vld [vmem:[%s5014_s20 + $0x18] sm:$0xff]  }
 0x3f2   : > { %4529 = vmatprep.mubr.msk.bf16.mxu1 %vm4814_vm0, %v6324_v1  ;;  %4691 = vmatprep.mubr.msk.bf16.mxu0 %vm4814_vm0, %v6324_v1  ;;  %v3582_v31 = vor.u32 %v3581_v6, %v3578_v2 }
 0x3f3   : > { %v4295_v22 = vpop.f32.mrf.mxu1  ;;  %v5752_v19 = vpop.f32.mrf.mxu0 }
 0x3f4   : > { %v3583_v38 = vsel %vm1483_vm6, %v3573_v24, %v3582_v31  ;;  %v4769_v31 = vld [vmem:[%s5014_s20 + $0x20] sm:$0xff]  }
 0x3f5   : > { %v5748_v36 = vpop.f32.mrf.mxu1  ;;  %v4471_v0 = vpop.f32.mrf.mxu0 }
 0x3f7   : > { %v4296_v54 = vpop.f32.mrf.mxu1  ;;  %v5762_v46 = vpop.f32.mrf.mxu0 }
 0x3f8   : > { %6326 = vst [vmem:[#allocation2_spill] sm:$0xff] %v5762_v46 }
 0x3f9   : > { %v5757_v13 = vpop.f32.mrf.mxu1  ;;  %4530 = vmatmul.mubr.msk.bf16.gmra.mxu1 %vm506_vm1, %v4765_v37  ;;  %v4472_v22 = vpop.f32.mrf.mxu0  ;;  %4692 = vmatmul.mubr.msk.bf16.gmra.mxu0 %vm506_vm1, %v3583_v38  ;;  %v1143_v38 = vadd.f32 %v5427_v14, %v5699_v28  ;;  %v4772_v14 = vld [vmem:[%s6320_s11 + $0x28] sm:$0xff]  }
 0x3fa   : > { %4533 = vmatprep.mubr.msk.bf16.mxu1 %vm4814_vm0, %v6324_v1 }
 0x3fb   : > { %v4299_v20 = vpop.f32.mrf.mxu1  ;;  %v5768_v47 = vpop.f32.mrf.mxu0 }
 0x3fc   : > { %6327 = vst [vmem:[#allocation3_spill] sm:$0xff] %v5768_v47  ;;  %v4771_v47 = vld [vmem:[%s5014_s20 + $0x60] sm:$0xff]  }
 0x3fd   : > { %v5765_v42 = vpop.f32.mrf.mxu1  ;;  %v4501_v37 = vpop.f32.mrf.mxu0 }
 0x3ff   : > { %v4300_v25 = vpop.f32.mrf.mxu1  ;;  %v5776_v0 = vpop.f32.mrf.mxu0 }
 0x400   : > { %6328 = vst [vmem:[#allocation4_spill] sm:$0xff] %v5776_v0  ;;  %v1146_v0 = vadd.f32 %v5439_v30, %v5708_v18 }
 0x401   : > { %v5771_v54 = vpop.f32.mrf.mxu1  ;;  %4534 = vmatmul.mubr.msk.bf16.gmra.mxu1 %vm506_vm1, %v4767_v62  ;;  %v4502_v24 = vpop.f32.mrf.mxu0 }
 0x402   : > { %4537 = vmatprep.mubr.msk.bf16.mxu1 %vm4814_vm0, %v6324_v1 }
 0x403   : > { %v4303_v2 = vpop.f32.mrf.mxu1  ;;  %v5781_v20 = vpop.f32.mrf.mxu0 }
 0x404   : > { %6329 = vst [vmem:[#allocation5_spill] sm:$0xff] %v5781_v20 }
 0x405   : > { %v5778_v6 = vpop.f32.mrf.mxu1  ;;  %v4505_v25 = vpop.f32.mrf.mxu0 }
 0x407   : > { %v4304_v22 = vpop.f32.mrf.mxu1  ;;  %v5790_v2 = vpop.f32.mrf.mxu0 }
 0x409   : > { %v1262_v37 = vpop.f32.mrf.mxu1  ;;  %4538 = vmatmul.mubr.msk.bf16.gmra.mxu1 %vm506_vm1, %v4769_v31  ;;  %v4506_v20 = vpop.f32.mrf.mxu0 }
 0x40a   : > { %v5786_v62 = vadd.f32 %v1262_v37, %v1143_v38  ;;  %4565 = vmatprep.mubr.msk.bf16.mxu1 %vm4814_vm0, %v6324_v1  ;;  %v1151_v38 = vadd.f32 %v5445_v39, %v5721_v29  ;;  %v1154_v20 = vadd.f32 %v5455_v45, %v5730_v12  ;;  %v4775_v29 = vld [vmem:[%s5014_s20 + $0x68] sm:$0xff]  }
 0x40b   : > { %v4335_v24 = vpop.f32.mrf.mxu1  ;;  %v5800_v28 = vpop.f32.mrf.mxu0 }
 0x40d   : > { %v1265_v22 = vpop.f32.mrf.mxu1  ;;  %v4509_v25 = vpop.f32.mrf.mxu0 }
 0x40e   : > { %v5795_v46 = vadd.f32 %v1265_v22, %v1146_v0 }
 0x40f   : > { %v4336_v31 = vpop.f32.mrf.mxu1  ;;  %v5809_v18 = vpop.f32.mrf.mxu0 }
 0x410   : > { %v1159_v31 = vadd.f32 %v5460_v48, %v5740_v5 }
 0x411   : > { %v1270_v37 = vpop.f32.mrf.mxu1  ;;  %4566 = vmatmul.mubr.msk.bf16.vlgmr.msra.gmra.mxu1 %vm506_vm1, %v4771_v47  ;;  %v4510_v24 = vpop.f32.mrf.mxu0 }
 0x412   : > { %v5805_v30 = vadd.f32 %v1270_v37, %v1151_v38  ;;  %4608 = vmatpush3.bf16.msra.mxu1 %v4772_v14  ;;  %4569 = vmatprep.mubr.msk.bf16.mxu1 %vm4814_vm0, %v6324_v1 }
 0x413   : > { %v4339_v0 = vpop.f32.mrf.mxu1  ;;  %4651 = vmatprep.subr.bf16.mxu1 %v6324_v1  ;;  %v5817_v47 = vpop.f32.mrf.mxu0 }
 0x414   : > { %6330 = vst [vmem:[#allocation6_spill] sm:$0xff] %v5817_v47  ;;  %v1162_v0 = vadd.f32 %v5471_v59, %v5748_v36 }
 0x415   : > { %v1273_v39 = vpop.f32.mrf.mxu1  ;;  %v4513_v38 = vpop.f32.mrf.mxu0 }
 0x416   : > { %v5815_v22 = vadd.f32 %v1273_v39, %v1154_v20  ;;  %v4777_v39 = vld [vmem:[%s5014_s20 + $0x70] sm:$0xff]  }
 0x417   : > { %v4340_v14 = vpop.f32.mrf.mxu1  ;;  %v5826_v45 = vpop.f32.mrf.mxu0 }
 0x418   : > { %6331 = vst [vmem:[#allocation7_spill] sm:$0xff] %v5826_v45  ;;  %v1167_v14 = vadd.f32 %v5483_v34, %v5757_v13  ;;  %v4784_v13 = vld [vmem:[%s5014_s20 + $0x60] sm:$0xff]  }
 0x419   : > { %v1278_v25 = vpop.f32.mrf.mxu1  ;;  %4570 = vmatmul.mubr.msk.bf16.gmra.mxu1 %vm506_vm1, %v4775_v29  ;;  %v4514_v20 = vpop.f32.mrf.mxu0 }
 0x41a   : > { %v5822_v37 = vadd.f32 %v1278_v25, %v1159_v31  ;;  %4573 = vmatprep.mubr.msk.bf16.mxu1 %vm4814_vm0, %v6324_v1 }
 0x41b   : > { %v4343_v12 = vpop.f32.mrf.mxu1  ;;  %v5833_v5 = vpop.f32.mrf.mxu0 }
 0x41c   : > { %6332 = vst [vmem:[#allocation8_spill] sm:$0xff] %v5833_v5  ;;  %v1170_v12 = vadd.f32 %v5493_v11, %v5765_v42  ;;  %v4785_v11 = vld [vmem:[%s5014_s20 + $0x68] sm:$0xff]   ;;  %v3068_v42 = vshll.u32 %v4784_v13, 16  ;;  %v1465_v5 = vadd.f32 %v5511_v35, %v5786_v62 }
 0x41d   : > { %v1281_v24 = vpop.f32.mrf.mxu1  ;;  %v4517_v31 = vpop.f32.mrf.mxu0 }
 0x41e   : > { %v5831_v48 = vadd.f32 %v1281_v24, %v1162_v0  ;;  %v4779_v24 = vld [vmem:[%s5014_s20 + $0x78] sm:$0xff]  }
 0x41f   : > { %v4344_v29 = vpop.f32.mrf.mxu1  ;;  %v5842_v59 = vpop.f32.mrf.mxu0 }
 0x420   : > { %6333 = vst [vmem:[#allocation9_spill] sm:$0xff] %v5842_v59 }
 0x421   : > { %v1286_v38 = vpop.f32.mrf.mxu1  ;;  %4574 = vmatmul.mubr.msk.bf16.gmra.mxu1 %vm506_vm1, %v4777_v39  ;;  %v4518_v0 = vpop.f32.mrf.mxu0 }
 0x422   : > { %v5838_v25 = vadd.f32 %v1286_v38, %v1167_v14  ;;  %4577 = vmatprep.mubr.msk.bf16.mxu1 %vm4814_vm0, %v6324_v1  ;;  %v1175_v14 = vadd.f32 %v5498_v16, %v5771_v54  ;;  %v4781_v16 = vld [vmem:[%s5014_s20 + $0x80] sm:$0xff]  }
 0x423   : > { %v4347_v36 = vpop.f32.mrf.mxu1  ;;  %v5850_v39 = vpop.f32.mrf.mxu0 }
 0x425   : > { %v1289_v20 = vpop.f32.mrf.mxu1  ;;  %v4545_v31 = vpop.f32.mrf.mxu0 }
 0x426   : > { %v5847_v34 = vadd.f32 %v1289_v20, %v1170_v12  ;;  %v1178_v20 = vadd.f32 %v5506_v23, %v5778_v6  ;;  %v3073_v31 = vshll.u32 %v4785_v11, 16  ;;  %v6334_v6 = vmov 0.0  }
 0x427   : > { %v4348_v29 = vpop.f32.mrf.mxu1  ;;  %v5860_v12 = vpop.f32.mrf.mxu0 }
 0x429   : > { %v1294_v38 = vpop.f32.mrf.mxu1  ;;  %4578 = vmatmul.mubr.msk.bf16.gmra.mxu1 %vm506_vm1, %v4779_v24  ;;  %v4546_v29 = vpop.f32.mrf.mxu0  ;;  %v3066_v24 = vshrl.u32 %v4784_v13, 16  ;;  %v4789_v13 = vld [vmem:[%s5014_s20 + $0x70] sm:$0xff]  }
 0x42a   : > { %v5855_v36 = vadd.f32 %v1294_v38, %v1175_v14  ;;  %4581 = vmatprep.mubr.msk.bf16.mxu1 %vm4814_vm0, %v6324_v1  ;;  %v3070_v14 = vrot.slane %v3068_v42, 1 }
 0x42b   : > { %v4351_v0 = vpop.f32.mrf.mxu1  ;;  %v5867_v38 = vpop.f32.mrf.mxu0 }
 0x42d   : > { %v1297_v59 = vpop.f32.mrf.mxu1  ;;  %v4549_v45 = vpop.f32.mrf.mxu0 }
 0x42e   : > { %v5865_v54 = vadd.f32 %v1297_v59, %v1178_v20  ;;  %v3071_v59 = vor.u32 %v3070_v14, %v3066_v24  ;;  %v3075_v20 = vrot.slane %v3073_v31, 1  ;;  %v3081_v24 = vshll.u32 %v4789_v13, 16 }
 0x42f   : > { %v4352_v1 = vpop.f32.mrf.mxu1  ;;  %v5877_v42 = vpop.f32.mrf.mxu0 }
 0x430   : > { %v1466_v1 = vadd.f32 %v5518_v8, %v5795_v46  ;;  %v3076_v45 = vsel %vm940_vm3, %v3071_v59, %v3075_v20 }
 0x431   : > { %v1598_v0 = vpop.f32.mrf.mxu1  ;;  %4582 = vmatmul.mubr.msk.bf16.gmra.mxu1 %vm506_vm1, %v4781_v16  ;;  %v4550_v47 = vpop.f32.mrf.mxu0  ;;  %v3077_v16 = vshrl.u32 %v4785_v11, 16  ;;  %v4791_v11 = vld [vmem:[%s5014_s20 + $0x78] sm:$0xff]  }
 0x432   : > { %v5872_v23 = vadd.f32 %v1598_v0, %v1465_v5  ;;  %4609 = vmatprep.mubr.msk.bf16.mxu1 %vm4814_vm0, %v6334_v6  ;;  %v4786_v5 = vld [vmem:[%s6320_s11 + $0x38] sm:$0xff]   ;;  %v1467_v0 = vadd.f32 %v5523_v49, %v5805_v30 }
 0x433   : > { %v4383_v29 = vpop.f32.mrf.mxu1  ;;  %v5887_v14 = vpop.f32.mrf.mxu0  ;;  %v3079_v59 = vor.u32 %v3077_v16, %v3075_v20  ;;  %v1469_v16 = vadd.f32 %v5538_v26, %v5822_v37 }
 0x434   : > { %v3083_v29 = vrot.slane %v3081_v24, 1 }
 0x435   : > { %v1601_v35 = vpop.f32.mrf.mxu1  ;;  %v4553_v8 = vpop.f32.mrf.mxu0 }
 0x436   : > { %v5881_v62 = vadd.f32 %v1601_v35, %v1466_v1 }
 0x437   : > { %v4384_v31 = vpop.f32.mrf.mxu1  ;;  %v5897_v1 = vpop.f32.mrf.mxu0 }
 0x438   : > { %v1468_v31 = vadd.f32 %v5530_v44, %v5815_v22 }
 0x439   : > { %v1606_v46 = vpop.f32.mrf.mxu1  ;;  %4610 = vmatmul.mubr.msk.bf16.vlgmr.msra.gmra.mxu1 %vm506_vm1, %v3076_v45  ;;  %v4554_v49 = vpop.f32.mrf.mxu0  ;;  %v3084_v45 = vsel %vm940_vm3, %v3079_v59, %v3083_v29  ;;  %v4793_v59 = vld [vmem:[%s5014_s20 + $0x80] sm:$0xff]  }
 0x43a   : > { %v5892_v47 = vadd.f32 %v1606_v46, %v1467_v0  ;;  %4652 = vmatpush3.bf16.msra.mxu1 %v4786_v5  ;;  %4613 = vmatprep.mubr.msk.bf16.mxu1 %vm4814_vm0, %v6334_v6  ;;  %v3085_v5 = vshrl.u32 %v4789_v13, 16  ;;  %v3089_v0 = vshll.u32 %v4791_v11, 16 }
 0x43b   : > { %v4387_v35 = vpop.f32.mrf.mxu1  ;;  %v5904_v46 = vpop.f32.mrf.mxu0 }
 0x43c   : > { %v3087_v22 = vor.u32 %v3085_v5, %v3083_v29  ;;  %v1471_v5 = vadd.f32 %v5558_v58, %v5838_v25 }
 0x43d   : > { %v1609_v30 = vpop.f32.mrf.mxu1  ;;  %v4557_v24 = vpop.f32.mrf.mxu0 }
 0x43e   : > { %v5901_v8 = vadd.f32 %v1609_v30, %v1468_v31  ;;  %v3091_v31 = vrot.slane %v3089_v0, 1  ;;  %v1470_v30 = vadd.f32 %v5549_v51, %v5831_v48  ;;  %v3097_v24 = vshll.u32 %v4793_v59, 16 }
 0x43f   : > { %v4388_v20 = vpop.f32.mrf.mxu1  ;;  %v5914_v13 = vpop.f32.mrf.mxu0 }
 0x441   : > { %v1614_v35 = vpop.f32.mrf.mxu1  ;;  %4614 = vmatmul.mubr.msk.bf16.gmra.mxu1 %vm506_vm1, %v3084_v45  ;;  %v4558_v20 = vpop.f32.mrf.mxu0  ;;  %v3092_v45 = vsel %vm940_vm3, %v3087_v22, %v3091_v31  ;;  %v4795_v22 = vld [vmem:[%s5014_s20 + $0x88] ss:$0 sps:$4 sm:$0x11]  }
 0x442   : > { %v5909_v44 = vadd.f32 %v1614_v35, %v1469_v16  ;;  %4617 = vmatprep.mubr.msk.bf16.mxu1 %vm4814_vm0, %v6334_v6  ;;  %v3093_v16 = vshrl.u32 %v4791_v11, 16 }
 0x443   : > { %v4391_v49 = vpop.f32.mrf.mxu1  ;;  %v5921_v35 = vpop.f32.mrf.mxu0 }
 0x444   : > { %6335 = vst [vmem:[#allocation10_spill] sm:$0xff] %v5921_v35  ;;  %v3095_v48 = vor.u32 %v3093_v16, %v3091_v31  ;;  %v1473_v31 = vadd.f32 %v5571_v61, %v5855_v36 }
 0x445   : > { %v1617_v26 = vpop.f32.mrf.mxu1  ;;  %v4561_v0 = vpop.f32.mrf.mxu0 }
 0x446   : > { %v5918_v37 = vadd.f32 %v1617_v26, %v1470_v30  ;;  %v3099_v30 = vrot.slane %v3097_v24, 1  ;;  %v1472_v26 = vadd.f32 %v5566_v60, %v5847_v34  ;;  %v3105_v0 = vshll.u32 %v4795_v22, 16 }
 0x447   : > { %v4392_v29 = vpop.f32.mrf.mxu1  ;;  %v5931_v11 = vpop.f32.mrf.mxu0 }
 0x449   : > { %v1622_v49 = vpop.f32.mrf.mxu1  ;;  %4618 = vmatmul.mubr.msk.bf16.gmra.mxu1 %vm506_vm1, %v3092_v45  ;;  %v4562_v29 = vpop.f32.mrf.mxu0  ;;  %v3100_v45 = vsel %vm940_vm3, %v3095_v48, %v3099_v30 }
 0x44a   : > { %v5926_v51 = vadd.f32 %v1622_v49, %v1471_v5  ;;  %4621 = vmatprep.mubr.msk.bf16.mxu1 %vm4814_vm0, %v6334_v6  ;;  %v3101_v5 = vshrl.u32 %v4793_v59, 16  ;;  %v3107_v59 = vrot.slane %v3105_v0, 1  ;;  %v4796_v29 = vld [vmem:[%s5014_s20 + $0x34] sm:$0xfe]  }
 0x44b   : > { %v4395_v20 = vpop.f32.mrf.mxu1  ;;  %v5938_v49 = vpop.f32.mrf.mxu0 }
 0x44c   : > { %v3103_v34 = vor.u32 %v3101_v5, %v3099_v30  ;;  %v1767_v30 = vadd.f32 %v5583_v53, %v5872_v23 }
 0x44d   : > { %v1625_v58 = vpop.f32.mrf.mxu1  ;;  %v4589_v16 = vpop.f32.mrf.mxu0 }
 0x44e   : > { %v5935_v25 = vadd.f32 %v1625_v58, %v1472_v26  ;;  %v3108_v26 = vsel %vm940_vm3, %v3103_v34, %v3107_v59  ;;  %v4797_v58 = vld [vmem:[%s5014_s20 + $0x3c] sm:$0xff]   ;;  %v1768_v59 = vadd.f32 %v5597_v17, %v5881_v62  ;;  %v883_v17 = vadd.f32 1e-05, %v5685_v33  ;;  %v4799_v33 = vld [vmem:[%s5014_s20 + $0x4c] sm:$0xff]  }
 0x44f   : > { %v4396_v35 = vpop.f32.mrf.mxu1  ;;  %v5947_v48 = vpop.f32.mrf.mxu0  ;;  %v3411_v16 = vrot.slane %v4797_v58, 1 }
 0x450   : > { %v1474_v35 = vadd.f32 %v5578_v10, %v5865_v54  ;;  %v3410_v54 = vrot.slane %v4796_v29, 1  ;;  %v1769_v29 = vadd.f32 %v5604_v21, %v5892_v47  ;;  %4803 = vrsqrt.f32 %v883_v17 }
 0x451   : > { %v1630_v24 = vpop.f32.mrf.mxu1  ;;  %4622 = vmatmul.mubr.msk.bf16.gmra.mxu1 %vm506_vm1, %v3100_v45  ;;  %v4590_v20 = vpop.f32.mrf.mxu0 }
 0x452   : > { %v5943_v60 = vadd.f32 %v1630_v24, %v1473_v31  ;;  %4625 = vmatprep.mubr.msk.bf16.mxu1 %vm4814_vm0, %v6334_v6  ;;  %v3412_v23 = vsel %vm1189_vm4, %v3410_v54, %v3411_v16  ;;  %v4798_v20 = vld [vmem:[%s5014_s20 + $0x44] sm:$0xff]   ;;  %v1770_v54 = vadd.f32 %v5616_v32, %v5901_v8  ;;  %v3415_v8 = vrot.slane %v4799_v33, 1 }
 0x453   : > { %v4399_v22 = vpop.f32.mrf.mxu1  ;;  %v5956_v45 = vpop.f32.mrf.mxu0 }
 0x455   : > { %v1633_v61 = vpop.f32.mrf.mxu1  ;;  %v4593_v5 = vpop.f32.mrf.mxu0 }
 0x456   : > { %v5951_v36 = vadd.f32 %v1633_v61, %v1474_v35 }
 0x457   : > { %v4400_v31 = vpop.f32.mrf.mxu1  ;;  %v5965_v24 = vpop.f32.mrf.mxu0 }
 0x459   : > { %v1892_v0 = vpop.f32.mrf.mxu1  ;;  %4626 = vmatmul.mubr.msk.bf16.gmra.mxu1 %vm506_vm1, %v3108_v26  ;;  %v4594_v22 = vpop.f32.mrf.mxu0 }
 0x45a   : > { %v5961_v10 = vadd.f32 %v1892_v0, %v1767_v30  ;;  %4653 = vmatprep.mubr.msk.bf16.mxu1 %vm4814_vm0, %v6334_v6  ;;  %v3413_v30 = vrot.slane %v4798_v20, 1 }
 0x45b   : > { %v4431_v34 = vpop.f32.mrf.mxu1  ;;  %v5973_v61 = vpop.f32.mrf.mxu0 }
 0x45d   : > { %v1895_v35 = vpop.f32.mrf.mxu1  ;;  %v4597_v58 = vpop.f32.mrf.mxu0 }
 0x45e   : > { %v5969_v53 = vadd.f32 %v1895_v35, %v1768_v59  ;;  %v3414_v59 = vsel %vm1189_vm4, %v3411_v16, %v3413_v30  ;;  %v1772_v58 = vadd.f32 %v5638_v57, %v5918_v37 }
 0x45f   : > { %v4432_v26 = vpop.f32.mrf.mxu1  ;;  %v5983_v5 = vpop.f32.mrf.mxu0 }
 0x461   : > { %v1900_v31 = vpop.f32.mrf.mxu1  ;;  %4654 = vmatmul.mubr.msk.bf16.vlgmr.msra.gmra.mxu1 %vm506_vm1, %v3412_v23  ;;  %v4598_v21 = vpop.f32.mrf.mxu0  ;;  %v1771_v23 = vadd.f32 %v5625_v41, %v5909_v44  ;;  %v3416_v41 = vsel %vm1189_vm4, %v3413_v30, %v3415_v8  ;;  %v4800_v44 = vld [vmem:[%s5014_s20 + $0x54] sm:$0xff]  }
 0x462   : > { %v5979_v62 = vadd.f32 %v1900_v31, %v1769_v29  ;;  %4657 = vmatprep.mubr.msk.bf16.mxu1 %vm4814_vm0, %v6334_v6  ;;  %v3417_v57 = vrot.slane %v4800_v44, 1  ;;  %v4804_v30 = vpop.eup %4803 }
 0x463   : > { %v4435_v0 = vpop.f32.mrf.mxu1  ;;  %v5991_v22 = vpop.f32.mrf.mxu0 }
 0x465   : > { %v1903_v47 = vpop.f32.mrf.mxu1  ;;  %v4601_v20 = vpop.f32.mrf.mxu0 }
 0x466   : > { %v5987_v34 = vadd.f32 %v1903_v47, %v1770_v54  ;;  %v1773_v47 = vadd.f32 %v5645_v55, %v5926_v51  ;;  %v1774_v20 = vadd.f32 %v5655_v56, %v5935_v25  ;;  %v887_v51 = vmul.f32 %v4804_v30, %v5062_v27  ;;  %v890_v30 = vld [vmem:[%s6314_s5] sm:$0x1] }
 0x467   : > { %v4436_v35 = vpop.f32.mrf.mxu1  ;;  %v6000_v29 = vpop.f32.mrf.mxu0 }
 0x469   : > { %v1908_v26 = vpop.f32.mrf.mxu1  ;;  %4658 = vmatmul.mubr.msk.bf16.gmra.mxu1 %vm506_vm1, %v3414_v59  ;;  %v4602_v31 = vpop.f32.mrf.mxu0 }
 0x46a   : > { %v5996_v32 = vadd.f32 %v1908_v26, %v1771_v23  ;;  %4661 = vmatprep.mubr.msk.bf16.mxu1 %vm4814_vm0, %v6334_v6  ;;  %v4802_v31 = vld [vmem:[%s5014_s20 + $0x5c] ss:$0 sps:$4 sm:$0x11]  }
 0x46b   : > { %v4439_v16 = vpop.f32.mrf.mxu1  ;;  %v6008_v54 = vpop.f32.mrf.mxu0 }
 0x46d   : > { %v1911_v17 = vpop.f32.mrf.mxu1  ;;  %v4605_v59 = vpop.f32.mrf.mxu0 }
 0x46e   : > { %v6004_v0 = vadd.f32 %v1911_v17, %v1772_v58  ;;  %v3418_v58 = vsel %vm1189_vm4, %v3415_v8, %v3417_v57  ;;  %v3419_v8 = vrot.slane %v4802_v31, 1 }
 0x46f   : > { %v4440_v21 = vpop.f32.mrf.mxu1  ;;  %v6017_v37 = vpop.f32.mrf.mxu0 }
 0x470   : > { %6336 = vst [vmem:[#allocation11_spill] sm:$0xff] %v6017_v37  ;;  %v1775_v21 = vadd.f32 %v5661_v50, %v5943_v60  ;;  %v1776_v50 = vadd.f32 %v5669_v3, %v5951_v36  ;;  %v6055_v3 = vld [vmem:[%s6318_s9] ss:$0 sm:$0xff] }
 0x471   : > { %v1916_v33 = vpop.f32.mrf.mxu1  ;;  %4662 = vmatmul.mubr.msk.bf16.gmra.mxu1 %vm506_vm1, %v3416_v41  ;;  %v4606_v26 = vpop.f32.mrf.mxu0  ;;  %v888_v41 = vld [vmem:[%s6313_s4] sm:$0x1] }
 0x472   : > { %v6013_v35 = vadd.f32 %v1916_v33, %v1773_v47  ;;  %4665 = vmatprep.mubr.msk.bf16.mxu1 %vm4814_vm0, %v6334_v6  ;;  %v889_v27 = vmul.f32 %v888_v41, %v887_v51  ;;  %v2277_v47 = vlaneseq  ;;  %v2103_v41 = vadd.f32 %v5674_v15, %v5961_v10 }
 0x473   : > { %v4443_v23 = vpop.f32.mrf.mxu1  ;;  %v6026_v17 = vpop.f32.mrf.mxu0 }
 0x474   : > { %v891_v26 = vadd.f32 %v890_v30, %v889_v27 }
 0x475   : > { %v1919_v55 = vpop.f32.mrf.mxu1  ;;  %v4633_v56 = vpop.f32.mrf.mxu0 }
 0x476   : > { %v6022_v16 = vadd.f32 %v1919_v55, %v1774_v20  ;;  %v2278_v55 = vshrl.u32 %v2277_v47, 7  ;;  %v892_v36 = vmax.f32 %v891_v26, 0.0  ;;  %v2104_v47 = vadd.f32 %v5689_v9, %v5969_v53 }
 0x477   : > { %v4444_v44 = vpop.f32.mrf.mxu1  ;;  %v6038_v33 = vpop.f32.mrf.mxu0 }
 0x478   : > { %v2279_v56 = vsub.s32 0, %v2278_v55 }
 0x479   : > { %v1924_v25 = vpop.f32.mrf.mxu1  ;;  %4666 = vmatmul.mubr.msk.bf16.gmra.mxu1 %vm506_vm1, %v3418_v58  ;;  %v4634_v60 = vpop.f32.mrf.mxu0  ;;  %v3420_v58 = vsel %vm1189_vm4, %v3417_v57, %v3419_v8  ;;  %v6063_v57 = vld [vmem:[%s6319_s10] ss:$0 sm:$0xff] }
 0x47a   : > { %v6034_v59 = vadd.f32 %v1924_v25, %v1775_v21  ;;  %4669 = vmatprep.mubr.msk.bf16.mxu1 %vm4814_vm0, %v6334_v6 }
 0x47b   : > { %v4447_v23 = vpop.f32.mrf.mxu1  ;;  %v6048_v6 = vpop.f32.mrf.mxu0 }
 0x47c   : > { %v6068_v23 = vrot.slane %v892_v36, %v2279_v56 }
 0x47d   : > { %v1927_v20 = vpop.f32.mrf.mxu1  ;;  %v4637_v44 = vpop.f32.mrf.mxu0 }
 0x47e   : > { %v6045_v51 = vadd.f32 %v1927_v20, %v1776_v50 }
 0x47f   : > { %v4448_v31 = vpop.f32.mrf.mxu1  ;;  %v6058_v27 = vpop.f32.mrf.mxu0 }
 0x480   : > { %v2105_v31 = vadd.f32 %v5692_v40, %v5979_v62 }
 0x481   : > { %v2194_v21 = vpop.f32.mrf.mxu1  ;;  %4670 = vmatmul.mubr.msk.bf16.gmra.mxu1 %vm506_vm1, %v3420_v58  ;;  %v4638_v8 = vpop.f32.mrf.mxu0 }
 0x482   : > { %v2233_v25 = vadd.f32 %v2194_v21, %v2103_v41 }
 0x483   : > { %v4479_v15 = vpop.f32.mrf.mxu1  ;;  %v6071_v20 = vpop.f32.mrf.mxu0 }
 0x484   : > { %v2250_v10 = vmul.f32 %v6055_v3, %v2233_v25  ;;  %v2106_v15 = vadd.f32 %v5705_v4, %v5987_v34 }
 0x485   : > { %v2197_v30 = vpop.f32.mrf.mxu1  ;;  %v4641_v41 = vpop.f32.mrf.mxu0 }
 0x486   : > { %v2267_v50 = vadd.f32 %v6063_v57, %v2250_v10  ;;  %v2234_v60 = vadd.f32 %v2197_v30, %v2104_v47 }
 0x487   : > { %v4480_v26 = vpop.f32.mrf.mxu1  ;;  %v6080_v21 = vpop.f32.mrf.mxu0 }
 0x488   : > { %v6074_v55 = vmul.f32 %v6068_v23, %v2267_v50  ;;  %v2251_v58 = vmul.f32 %v6055_v3, %v2234_v60  ;;  %v2107_v26 = vadd.f32 %v5714_v63, %v5996_v32 }
 0x489   : > { %v2202_v9 = vpop.f32.mrf.mxu1  ;;  %v4642_v10 = vpop.f32.mrf.mxu0 }
 0x48a   : > { %v2268_v53 = vadd.f32 %v6063_v57, %v2251_v58  ;;  %v2235_v44 = vadd.f32 %v2202_v9, %v2105_v31 }
 0x48b   : > { %v4483_v36 = vpop.f32.mrf.mxu1  ;;  %v6089_v8 = vpop.f32.mrf.mxu0 }
 0x48c   : > { %v6083_v56 = vmul.f32 %v6068_v23, %v2268_v53  ;;  %v2252_v25 = vmul.f32 %v6055_v3, %v2235_v44  ;;  %v2108_v36 = vadd.f32 %v5726_v43, %v6004_v0 }
 0x48d   : > { %v2205_v47 = vpop.f32.mrf.mxu1  ;;  %v4645_v58 = vpop.f32.mrf.mxu0 }
 0x48e   : > { %v2269_v40 = vadd.f32 %v6063_v57, %v2252_v25  ;;  %v2236_v62 = vadd.f32 %v2205_v47, %v2106_v15 }
 0x48f   : > { %v4484_v30 = vpop.f32.mrf.mxu1  ;;  %v6098_v41 = vpop.f32.mrf.mxu0 }
 0x490   : > { %v6092_v50 = vmul.f32 %v6068_v23, %v2269_v40  ;;  %v2253_v60 = vmul.f32 %v6055_v3, %v2236_v62  ;;  %6337 = vst [vmem:[#allocation12_spill] sm:$0xff] %v6098_v41  ;;  %v2109_v30 = vadd.f32 %v5733_v52, %v6013_v35 }
 0x491   : > { %v2210_v31 = vpop.f32.mrf.mxu1  ;;  %v4646_v25 = vpop.f32.mrf.mxu0 }
 0x492   : > { %v2270_v4 = vadd.f32 %v6063_v57, %v2253_v60  ;;  %v2237_v34 = vadd.f32 %v2210_v31, %v2107_v26 }
 0x493   : > { %v4487_v9 = vpop.f32.mrf.mxu1  ;;  %v6107_v10 = vpop.f32.mrf.mxu0 }
 0x494   : > { %v6101_v53 = vmul.f32 %v6068_v23, %v2270_v4  ;;  %v2254_v44 = vmul.f32 %v6055_v3, %v2237_v34  ;;  %6338 = vst [vmem:[#allocation13_spill] sm:$0xff] %v6107_v10  ;;  %v2110_v9 = vadd.f32 %v5745_v7, %v6022_v16 }
 0x495   : > { %v2213_v15 = vpop.f32.mrf.mxu1  ;;  %v4649_v60 = vpop.f32.mrf.mxu0 }
 0x496   : > { %v2271_v63 = vadd.f32 %v6063_v57, %v2254_v44  ;;  %v2238_v32 = vadd.f32 %v2213_v15, %v2108_v36 }
 0x497   : > { %v4488_v47 = vpop.f32.mrf.mxu1  ;;  %v6116_v58 = vpop.f32.mrf.mxu0 }
 0x498   : > { %v6110_v40 = vmul.f32 %v6068_v23, %v2271_v63  ;;  %v2255_v62 = vmul.f32 %v6055_v3, %v2238_v32  ;;  %6340 = vst [vmem:[#allocation15_spill] sm:$0xff] %v6116_v58  ;;  %v2111_v47 = vadd.f32 %v5752_v19, %v6034_v59 }
 0x499   : > { %v2218_v26 = vpop.f32.mrf.mxu1  ;;  %v4650_v44 = vpop.f32.mrf.mxu0 }
 0x49a   : > { %6339 = vst [vmem:[#allocation14_spill] sm:$0xff] %v6110_v40  ;;  %v2272_v43 = vadd.f32 %v6063_v57, %v2255_v62  ;;  %v2239_v0 = vadd.f32 %v2218_v26, %v2109_v30 }
 0x49b   : > { %v4491_v31 = vpop.f32.mrf.mxu1  ;;  %v6125_v25 = vpop.f32.mrf.mxu0 }
 0x49c   : > { %v6119_v4 = vmul.f32 %v6068_v23, %v2272_v43  ;;  %v2256_v34 = vmul.f32 %v6055_v3, %v2239_v0  ;;  %v6344_v31 = vld [vmem:[#allocation2_spill] sm:$0xff] }
 0x49d   : > { %v2221_v36 = vpop.f32.mrf.mxu1  ;;  %v4677_v62 = vpop.f32.mrf.mxu0 }
 0x49e   : > { %6341 = vst [vmem:[#allocation16_spill] sm:$0xff] %v6119_v4  ;;  %v2273_v52 = vadd.f32 %v6063_v57, %v2256_v34  ;;  %v2240_v35 = vadd.f32 %v2221_v36, %v2110_v9  ;;  %v2112_v34 = vadd.f32 %v6344_v31, %v6045_v51 }
 0x49f   : > { %v4492_v15 = vpop.f32.mrf.mxu1  ;;  %v6134_v60 = vpop.f32.mrf.mxu0 }
 0x4a0   : > { %v6128_v63 = vmul.f32 %v6068_v23, %v2273_v52  ;;  %v2257_v32 = vmul.f32 %v6055_v3, %v2240_v35 }
 0x4a1   : > { %v2226_v30 = vpop.f32.mrf.mxu1  ;;  %v4678_v9 = vpop.f32.mrf.mxu0 }
 0x4a2   : > { %6342 = vst [vmem:[#allocation17_spill] sm:$0xff] %v6128_v63  ;;  %v2274_v7 = vadd.f32 %v6063_v57, %v2257_v32  ;;  %v2241_v16 = vadd.f32 %v2226_v30, %v2111_v47 }
 0x4a3   : > { %v4495_v26 = vpop.f32.mrf.mxu1  ;;  %v6143_v36 = vpop.f32.mrf.mxu0 }
 0x4a4   : > { %v6137_v43 = vmul.f32 %v6068_v23, %v2274_v7  ;;  %v2258_v0 = vmul.f32 %v6055_v3, %v2241_v16 }
 0x4a5   : > { %v2229_v44 = vpop.f32.mrf.mxu1  ;;  %v4681_v32 = vpop.f32.mrf.mxu0 }
 0x4a6   : > { %6343 = vst [vmem:[#allocation18_spill] sm:$0xff] %v6137_v43  ;;  %v2275_v19 = vadd.f32 %v6063_v57, %v2258_v0  ;;  %v2242_v59 = vadd.f32 %v2229_v44, %v2112_v34 }
 0x4a7   : > { %v4496_v52 = vpop.f32.mrf.mxu1  ;;  %v6150_v30 = vpop.f32.mrf.mxu0 }
 0x4a8   : > { %v6146_v35 = vmul.f32 %v6068_v23, %v2275_v19  ;;  %v2259_v15 = vmul.f32 %v6055_v3, %v2242_v59 }
 0x4a9   : > { %v2514_v47 = vpop.f32.mrf.mxu1  ;;  %v4682_v16 = vpop.f32.mrf.mxu0 }
 0x4aa   : > { %6345 = vst [vmem:[#allocation2_spill] sm:$0xff] %v6146_v35  ;;  %v2276_v62 = vadd.f32 %v6063_v57, %v2259_v15 }
 0x4ab   : > { %v4523_v51 = vpop.f32.mrf.mxu1  ;;  %v6155_v0 = vpop.f32.mrf.mxu0 }
 0x4ac   : > { %v6153_v7 = vmul.f32 %v6068_v23, %v2276_v62 }
 0x4ad   : > { %v2517_v26 = vpop.f32.mrf.mxu1  ;;  %v4685_v34 = vpop.f32.mrf.mxu0 }
 0x4ae   : > { %6346 = vst [vmem:[#allocation19_spill] sm:$0xff] %v6153_v7 }
 0x4af   : > { %v4524_v31 = vpop.f32.mrf.mxu1  ;;  %v6157_v44 = vpop.f32.mrf.mxu0 }
 0x4b1   : > { %v2522_v9 = vpop.f32.mrf.mxu1  ;;  %v4686_v19 = vpop.f32.mrf.mxu0 }
 0x4b3   : > { %v4527_v3 = vpop.f32.mrf.mxu1  ;;  %v6159_v52 = vpop.f32.mrf.mxu0 }
 0x4b4   : > { %6347 = vst [vmem:[#allocation20_spill] sm:$0xff] %v6159_v52  ;;  %v6353_v52 = vld [vmem:[#allocation5_spill] sm:$0xff] }
 0x4b5   : > { %v2525_v59 = vpop.f32.mrf.mxu1  ;;  %v4689_v15 = vpop.f32.mrf.mxu0 }
 0x4b6   : > { %v6351_v15 = vld [vmem:[#allocation3_spill] sm:$0xff] }
 0x4b7   : > { %v4528_v57 = vpop.f32.mrf.mxu1  ;;  %v6161_v51 = vpop.f32.mrf.mxu0  ;;  %v2515_v4 = vadd.f32 %v2514_v47, %v6351_v15 }
 0x4b8   : > { %6348 = vst [vmem:[#allocation21_spill] sm:$0xff] %v6161_v51 }
 0x4b9   : > { %v2530_v32 = vpop.f32.mrf.mxu1  ;;  %v4690_v62 = vpop.f32.mrf.mxu0  ;;  %v2732_v41 = vadd.f32 %v5850_v39, %v2515_v4 }
 0x4ba   : > { %v2531_v39 = vadd.f32 %v2530_v32, %v5800_v28  ;;  %v6355_v32 = vld [vmem:[#allocation7_spill] sm:$0xff] }
 0x4bb   : > { %v4531_v23 = vpop.f32.mrf.mxu1  ;;  %v6163_v7 = vpop.f32.mrf.mxu0 }
 0x4bc   : > { %6349 = vst [vmem:[#allocation22_spill] sm:$0xff] %v6163_v7  ;;  %v6352_v23 = vld [vmem:[#allocation4_spill] sm:$0xff] }
 0x4bd   : > { %v2533_v16 = vpop.f32.mrf.mxu1  ;;  %v4693_v34 = vpop.f32.mrf.mxu0  ;;  %v2518_v62 = vadd.f32 %v2517_v26, %v6352_v23 }
 0x4bf   : > { %v4532_v31 = vpop.f32.mrf.mxu1  ;;  %v6165_v43 = vpop.f32.mrf.mxu0 }
 0x4c0   : > { %6350 = vst [vmem:[#allocation23_spill] sm:$0xff] %v6165_v43  ;;  %v2523_v43 = vadd.f32 %v2522_v9, %v6353_v52  ;;  %v2736_v52 = vadd.f32 %v5887_v14, %v2531_v39 }
 0x4c1   : > { %v2538_v35 = vpop.f32.mrf.mxu1  ;;  %v4694_v19 = vpop.f32.mrf.mxu0 }
 0x4c2   : > { %v2734_v47 = vadd.f32 %v5867_v38, %v2523_v43  ;;  %v6354_v38 = vld [vmem:[#allocation6_spill] sm:$0xff] }
 0x4c3   : > { %v4535_v3 = vpop.f32.mrf.mxu1  ;;  %v2539_v43 = vadd.f32 %v2538_v35, %v6354_v38 }
 0x4c4   : > { %v2733_v3 = vadd.f32 %v5860_v12, %v2518_v62  ;;  %v2534_v12 = vadd.f32 %v2533_v16, %v5809_v18  ;;  %v6356_v16 = vld [vmem:[#allocation8_spill] sm:$0xff] }
 0x4c5   : > { %v2541_v58 = vpop.f32.mrf.mxu1 }
 0x4c7   : > { %v4536_v63 = vpop.f32.mrf.mxu1 }
 0x4c9   : > { %v2546_v10 = vpop.f32.mrf.mxu1 }
 0x4cb   : > { %v4539_v57 = vpop.f32.mrf.mxu1 }
 0x4cc   : > { %v2526_v57 = vadd.f32 %v2525_v59, %v5790_v2  ;;  %v2737_v59 = vadd.f32 %v5897_v1, %v2534_v12 }
 0x4cd   : > { %v2549_v37 = vpop.f32.mrf.mxu1 }
 0x4cf   : > { %v4540_v51 = vpop.f32.mrf.mxu1 }
 0x4d1   : > { %v2834_v7 = vpop.f32.mrf.mxu1 }
 0x4d2   : > { %v6170_v31 = vadd.f32 %v2834_v7, %v2732_v41  ;;  %v2735_v41 = vadd.f32 %v5877_v42, %v2526_v57  ;;  %v2547_v57 = vadd.f32 %v2546_v10, %v6356_v16 }
 0x4d3   : > { %v4567_v34 = vpop.f32.mrf.mxu1 }
 0x4d4   : > { %v2542_v34 = vadd.f32 %v2541_v58, %v6355_v32 }
 0x4d5   : > { %v2837_v19 = vpop.f32.mrf.mxu1 }
 0x4d6   : > { %v2874_v63 = vadd.f32 %v2837_v19, %v2733_v3  ;;  %v2738_v3 = vadd.f32 %v5904_v46, %v2539_v43 }
 0x4d7   : > { %v4568_v40 = vpop.f32.mrf.mxu1 }
 0x4d9   : > { %v2842_v51 = vpop.f32.mrf.mxu1 }
 0x4da   : > { %v2875_v15 = vadd.f32 %v2842_v51, %v2734_v47  ;;  %v2739_v47 = vadd.f32 %v5914_v13, %v2542_v34 }
 0x4db   : > { %v4571_v26 = vpop.f32.mrf.mxu1 }
 0x4dc   : > { %v6357_v26 = vld [vmem:[#allocation9_spill] sm:$0xff] }
 0x4dd   : > { %v2845_v4 = vpop.f32.mrf.mxu1  ;;  %v2550_v39 = vadd.f32 %v2549_v37, %v6357_v26 }
 0x4de   : > { %v6178_v7 = vadd.f32 %v2845_v4, %v2735_v41  ;;  %v6358_v41 = vld [vmem:[#allocation10_spill] sm:$0xff] }
 0x4df   : > { %v4572_v9 = vpop.f32.mrf.mxu1  ;;  %v2740_v4 = vadd.f32 %v6358_v41, %v2547_v57  ;;  %v2741_v12 = vadd.f32 %v5931_v11, %v2550_v39  ;;  %v3015_v41 = vadd.f32 %v5947_v48, %v2874_v63  ;;  %v6224_v63 = vld [vmem:[%s6322_s13] ss:$0 sm:$0xff] }
 0x4e1   : > { %v2850_v40 = vpop.f32.mrf.mxu1 }
 0x4e2   : > { %v6182_v23 = vadd.f32 %v2850_v40, %v2736_v52 }
 0x4e3   : > { %v4575_v2 = vpop.f32.mrf.mxu1 }
 0x4e5   : > { %v2853_v62 = vpop.f32.mrf.mxu1 }
 0x4e6   : > { %v6186_v28 = vadd.f32 %v2853_v62, %v2737_v59 }
 0x4e7   : > { %v4576_v42 = vpop.f32.mrf.mxu1 }
 0x4e9   : > { %v2858_v19 = vpop.f32.mrf.mxu1 }
 0x4ea   : > { %v6190_v18 = vadd.f32 %v2858_v19, %v2738_v3 }
 0x4eb   : > { %v4579_v14 = vpop.f32.mrf.mxu1 }
 0x4ed   : > { %v2861_v51 = vpop.f32.mrf.mxu1 }
 0x4ee   : > { %v6194_v35 = vadd.f32 %v2861_v51, %v2739_v47  ;;  %v3014_v51 = vadd.f32 %v5938_v49, %v6170_v31 }
 0x4ef   : > { %v4580_v1 = vpop.f32.mrf.mxu1 }
 0x4f1   : > { %v2866_v9 = vpop.f32.mrf.mxu1 }
 0x4f2   : > { %v6198_v58 = vadd.f32 %v2866_v9, %v2740_v4 }
 0x4f3   : > { %v4583_v46 = vpop.f32.mrf.mxu1 }
 0x4f5   : > { %v2869_v52 = vpop.f32.mrf.mxu1 }
 0x4f6   : > { %v6201_v40 = vadd.f32 %v2869_v52, %v2741_v12  ;;  %v3016_v52 = vadd.f32 %v5956_v45, %v2875_v15  ;;  %v3017_v45 = vadd.f32 %v5965_v24, %v6178_v7 }
 0x4f7   : > { %v4584_v10 = vpop.f32.mrf.mxu1 }
 0x4f9   : > { %v3164_v2 = vpop.f32.mrf.mxu1 }
 0x4fa   : > { %v3203_v26 = vadd.f32 %v3164_v2, %v3014_v51 }
 0x4fb   : > { %v4611_v13 = vpop.f32.mrf.mxu1 }
 0x4fc   : > { %v3359_v46 = vadd.f32 %v6026_v17, %v3203_v26  ;;  %v6217_v13 = vld [vmem:[%s6321_s12] ss:$0 sm:$0xff] }
 0x4fd   : > { %v3167_v38 = vpop.f32.mrf.mxu1 }
 0x4fe   : > { %v3204_v9 = vadd.f32 %v3167_v38, %v3015_v41 }
 0x4ff   : > { %v4612_v43 = vpop.f32.mrf.mxu1 }
 0x500   : > { %v3360_v48 = vadd.f32 %v6038_v33, %v3204_v9 }
 0x501   : > { %v3172_v59 = vpop.f32.mrf.mxu1 }
 0x502   : > { %v3205_v31 = vadd.f32 %v3172_v59, %v3016_v52 }
 0x503   : > { %v4615_v62 = vpop.f32.mrf.mxu1 }
 0x504   : > { %v3361_v33 = vadd.f32 %v6048_v6, %v3205_v31 }
 0x505   : > { %v3175_v42 = vpop.f32.mrf.mxu1 }
 0x506   : > { %v3206_v62 = vadd.f32 %v3175_v42, %v3017_v45 }
 0x507   : > { %v4616_v37 = vpop.f32.mrf.mxu1 }
 0x508   : > { %v3018_v37 = vadd.f32 %v5973_v61, %v6182_v23  ;;  %v3362_v61 = vadd.f32 %v6058_v27, %v3206_v62  ;;  %v3019_v23 = vadd.f32 %v5983_v5, %v6186_v28 }
 0x509   : > { %v3180_v32 = vpop.f32.mrf.mxu1 }
 0x50a   : > { %v3207_v42 = vadd.f32 %v3180_v32, %v3018_v37 }
 0x50b   : > { %v4619_v34 = vpop.f32.mrf.mxu1 }
 0x50c   : > { %v3363_v41 = vadd.f32 %v6071_v20, %v3207_v42 }
 0x50d   : > { %v3183_v3 = vpop.f32.mrf.mxu1 }
 0x50f   : > { %v4620_v19 = vpop.f32.mrf.mxu1 }
 0x511   : > { %v3188_v14 = vpop.f32.mrf.mxu1 }
 0x513   : > { %v4623_v16 = vpop.f32.mrf.mxu1 }
 0x515   : > { %v6203_v57 = vpop.f32.mrf.mxu1 }
 0x517   : > { %v4624_v11 = vpop.f32.mrf.mxu1 }
 0x519   : > { %v6205_v47 = vpop.f32.mrf.mxu1 }
 0x51b   : > { %v4627_v1 = vpop.f32.mrf.mxu1 }
 0x51d   : > { %v6209_v39 = vpop.f32.mrf.mxu1 }
 0x51f   : > { %v4628_v4 = vpop.f32.mrf.mxu1 }
 0x520   : > { %v3208_v4 = vadd.f32 %v3183_v3, %v3019_v23 }
 0x521   : > { %v3476_v12 = vpop.f32.mrf.mxu1 }
 0x522   : > { %v3515_v10 = vadd.f32 %v3476_v12, %v3359_v46  ;;  %v3020_v46 = vadd.f32 %v5991_v22, %v6190_v18  ;;  %v3021_v22 = vadd.f32 %v6000_v29, %v6194_v35  ;;  %v3022_v29 = vadd.f32 %v6008_v54, %v6198_v58  ;;  %v6362_v54 = vld [vmem:[#allocation11_spill] sm:$0xff] }
 0x523   : > { %v4655_v49 = vpop.f32.mrf.mxu1  ;;  %v3023_v58 = vadd.f32 %v6362_v54, %v6201_v40  ;;  %v6366_v40 = vld [vmem:[#allocation17_spill] sm:$0xff] }
 0x524   : > { %v3678_v2 = vadd.f32 %v6125_v25, %v3515_v10  ;;  %v3209_v52 = vadd.f32 %v3188_v14, %v3020_v46 }
 0x525   : > { %v3479_v17 = vpop.f32.mrf.mxu1 }
 0x526   : > { %v3695_v15 = vmul.f32 %v6217_v13, %v3678_v2  ;;  %v3516_v38 = vadd.f32 %v3479_v17, %v3360_v48  ;;  %v3365_v48 = vadd.f32 %v6089_v8, %v3209_v52  ;;  %v3210_v17 = vadd.f32 %v6203_v57, %v3021_v22 }
 0x527   : > { %v4656_v43 = vpop.f32.mrf.mxu1  ;;  %v3211_v8 = vadd.f32 %v6205_v47, %v3022_v29 }
 0x528   : > { %v3712_v59 = vadd.f32 %v6224_v63, %v3695_v15  ;;  %v3679_v25 = vadd.f32 %v6134_v60, %v3516_v38 }
 0x529   : > { %v3484_v34 = vpop.f32.mrf.mxu1 }
 0x52a   : > { %v3722_v19 = vadd.f32 %v3712_v59, %v6074_v55  ;;  %v3696_v24 = vmul.f32 %v6217_v13, %v3679_v25  ;;  %v3517_v7 = vadd.f32 %v3484_v34, %v3361_v33  ;;  %v6360_v25 = vld [vmem:[#allocation20_spill] sm:$0xff] }
 0x52b   : > { %v4659_v16 = vpop.f32.mrf.mxu1 }
 0x52c   : > { %v3732_v60 = vmax.f32 %v3722_v19, 0.0  ;;  %v3713_v6 = vadd.f32 %v6224_v63, %v3696_v24  ;;  %v3680_v11 = vadd.f32 %v6143_v36, %v3517_v7  ;;  %v6363_v19 = vld [vmem:[#allocation16_spill] sm:$0xff]  ;;  %v6364_v16 = vld [vmem:[#allocation13_spill] sm:$0xff] }
 0x52d   : > { %v3487_v55 = vpop.f32.mrf.mxu1 }
 0x52e   : > { %3742 = vst [vmem:[%s6240_s30] sm:$0xff] %v3732_v60  ;;  %v3723_v51 = vadd.f32 %v3713_v6, %v6083_v56  ;;  %v3697_v1 = vmul.f32 %v6217_v13, %v3680_v11  ;;  %v3518_v26 = vadd.f32 %v3487_v55, %v3362_v61  ;;  %v3367_v60 = vadd.f32 %v6364_v16, %v3211_v8  ;;  %v6365_v55 = vld [vmem:[#allocation21_spill] sm:$0xff] }
 0x52f   : > { %v4660_v32 = vpop.f32.mrf.mxu1  ;;  %v3212_v6 = vadd.f32 %v6209_v39, %v3023_v58  ;;  %v6368_v39 = vld [vmem:[#allocation15_spill] sm:$0xff] }
 0x530   : > { %v3733_v9 = vmax.f32 %v3723_v51, 0.0  ;;  %v3714_v36 = vadd.f32 %v6224_v63, %v3697_v1  ;;  %v3681_v27 = vadd.f32 %v6150_v30, %v3518_v26  ;;  %v3364_v30 = vadd.f32 %v6080_v21, %v3208_v4 }
 0x531   : > { %v3492_v5 = vpop.f32.mrf.mxu1  ;;  %v3368_v46 = vadd.f32 %v6368_v39, %v3212_v6 }
 0x532   : > { %3743 = vst [vmem:[%s6240_s30 + $0x8] sm:$0xff] %v3733_v9  ;;  %v3724_v56 = vadd.f32 %v3714_v36, %v6092_v50  ;;  %v3698_v28 = vmul.f32 %v6217_v13, %v3681_v27  ;;  %v3519_v12 = vadd.f32 %v3492_v5, %v3363_v41  ;;  %v6367_v36 = vld [vmem:[#allocation22_spill] sm:$0xff] }
 0x533   : > { %v4663_v10 = vpop.f32.mrf.mxu1 }
 0x534   : > { %v3734_v20 = vmax.f32 %v3724_v56, 0.0  ;;  %v3715_v3 = vadd.f32 %v6224_v63, %v3698_v28  ;;  %v3682_v49 = vadd.f32 %v6155_v0, %v3519_v12  ;;  %v6369_v56 = vld [vmem:[#allocation18_spill] sm:$0xff] }
 0x535   : > { %v3495_v31 = vpop.f32.mrf.mxu1 }
 0x536   : > { %3744 = vst [vmem:[%s6240_s30 + $0x10] sm:$0xff] %v3734_v20  ;;  %v3725_v50 = vadd.f32 %v3715_v3, %v6101_v53  ;;  %v3699_v18 = vmul.f32 %v6217_v13, %v3682_v49  ;;  %v3520_v2 = vadd.f32 %v3495_v31, %v3364_v30  ;;  %v6359_v53 = vld [vmem:[#allocation14_spill] sm:$0xff]  ;;  %v6370_v49 = vld [vmem:[#allocation23_spill] sm:$0xff] }
 0x537   : > { %v4664_v14 = vpop.f32.mrf.mxu1  ;;  %v6371_v31 = vld [vmem:[#allocation2_spill] sm:$0xff] }
 0x538   : > { %v3735_v45 = vmax.f32 %v3725_v50, 0.0  ;;  %v3716_v0 = vadd.f32 %v6224_v63, %v3699_v18  ;;  %v3683_v21 = vadd.f32 %v6157_v44, %v3520_v2  ;;  %v6361_v44 = vld [vmem:[#allocation12_spill] sm:$0xff]  ;;  %v6372_v14 = vld [vmem:[#allocation19_spill] sm:$0xff] }
 0x539   : > { %v3500_v35 = vpop.f32.mrf.mxu1  ;;  %v3366_v37 = vadd.f32 %v6361_v44, %v3210_v17 }
 0x53a   : > { %3745 = vst [vmem:[%s6240_s30 + $0x18] sm:$0xff] %v3735_v45  ;;  %v3726_v15 = vadd.f32 %v3716_v0, %v6359_v53  ;;  %v3700_v38 = vmul.f32 %v6217_v13, %v3683_v21  ;;  %v3521_v43 = vadd.f32 %v3500_v35, %v3365_v48 }
 0x53b   : > { %v4667_v62 = vpop.f32.mrf.mxu1 }
 0x53c   : > { %v3736_v57 = vmax.f32 %v3726_v15, 0.0  ;;  %v3717_v59 = vadd.f32 %v6224_v63, %v3700_v38  ;;  %v3684_v33 = vadd.f32 %v6360_v25, %v3521_v43 }
 0x53d   : > { %v3503_v34 = vpop.f32.mrf.mxu1 }
 0x53e   : > { %3746 = vst [vmem:[%s6240_s30 + $0x20] sm:$0xff] %v3736_v57  ;;  %v3727_v24 = vadd.f32 %v3717_v59, %v6363_v19  ;;  %v3701_v7 = vmul.f32 %v6217_v13, %v3684_v33  ;;  %v3522_v42 = vadd.f32 %v3503_v34, %v3366_v37 }
 0x53f   : > { %v4668_v47 = vpop.f32.mrf.mxu1 }
 0x540   : > { %v3737_v11 = vmax.f32 %v3727_v24, 0.0  ;;  %v3718_v61 = vadd.f32 %v6224_v63, %v3701_v7  ;;  %v3685_v23 = vadd.f32 %v6365_v55, %v3522_v42 }
 0x541   : > { %v3508_v51 = vpop.f32.mrf.mxu1 }
 0x542   : > { %3747 = vst [vmem:[%s6240_s30 + $0x28] sm:$0xff] %v3737_v11  ;;  %v3728_v1 = vadd.f32 %v3718_v61, %v6366_v40  ;;  %v3702_v26 = vmul.f32 %v6217_v13, %v3685_v23  ;;  %v3523_v32 = vadd.f32 %v3508_v51, %v3367_v60 }
 0x543   : > { %v4671_v41 = vpop.f32.mrf.mxu1 }
 0x544   : > { %v3738_v4 = vmax.f32 %v3728_v1, 0.0  ;;  %v3719_v9 = vadd.f32 %v6224_v63, %v3702_v26  ;;  %v3686_v27 = vadd.f32 %v6367_v36, %v3523_v32 }
 0x545   : > { %v3511_v5 = vpop.f32.mrf.mxu1 }
 0x546   : > { %3748 = vst [vmem:[%s6240_s30 + $0x30] sm:$0xff] %v3738_v4  ;;  %v3729_v28 = vadd.f32 %v3719_v9, %v6369_v56  ;;  %v3703_v12 = vmul.f32 %v6217_v13, %v3686_v27  ;;  %v3524_v52 = vadd.f32 %v3511_v5, %v3368_v46 }
 0x547   : > { %v4672_v10 = vpop.f32.mrf.mxu1 }
 0x548   : > { %v3739_v20 = vmax.f32 %v3729_v28, 0.0  ;;  %v3720_v3 = vadd.f32 %v6224_v63, %v3703_v12  ;;  %v3687_v30 = vadd.f32 %v6370_v49, %v3524_v52 }
 0x54a   : > { %3749 = vst [vmem:[%s6240_s30 + $0x38] sm:$0xff] %v3739_v20  ;;  %v3730_v22 = vadd.f32 %v3720_v3, %v6371_v31  ;;  %v3704_v50 = vmul.f32 %v6217_v13, %v3687_v30 }
 0x54c   : > { %v3740_v18 = vmax.f32 %v3730_v22, 0.0  ;;  %v3721_v2 = vadd.f32 %v6224_v63, %v3704_v50 }
 0x54e   : > { %3750 = vst [vmem:[%s6240_s30 + $0x40] sm:$0xff] %v3740_v18  ;;  %v3731_v48 = vadd.f32 %v3721_v2, %v6372_v14 }
 0x550   : > { %v3741_v17 = vmax.f32 %v3731_v48, 0.0 }
 0x552   : > { %3751 = vst [vmem:[%s6240_s30 + $0x48] sm:$0xff] %v3741_v17 }
 0x553 PF: > { %s24_s29 = sadd.s32 1, %s4811_s29  }
 0x554   : > { %p21_p4 = scmp.ge.s32.totalorder %s24_s29, 4  }
 0x556   :  { %23 = sbr.rel (!%p21_p4) target bundleno = 1 (0x1), region = 112 }

</bundles_post_ra>
